<compile_context>
chip_gen: v6e
topology: v6e:2x2x1
jax: 0.10.0
libtpu: 0.0.40
codegen_flags: <defaults>
</compile_context>

<pallas_src>
import functools

import jax
import jax.numpy as jnp
from jax.experimental import pallas as pl
from jax.experimental.pallas import tpu as pltpu

EPS1 = 1.0132789611816406e-06
EPS2 = 1.0132789611816406e-06


# ----------------------------------------------------------------------------
# Fast kernel: lane-dense I/O + single relayout + 2D weight-stationary matmuls
# ----------------------------------------------------------------------------
def _mixer_kernel_fast(x_ref, slab_ref, w1_ref, w2_ref, w3t_ref, w4t_ref,
                       o_ref, *, P, H, D, K1, K2):
    TB = x_ref.shape[0]
    N = TB * H
    inv_d = 1.0 / D

    slab = slab_ref[...]
    g1 = slab[0, :D]
    b1 = slab[1, :K1]
    b2 = slab[2, :P]
    g2 = slab[3, :D]
    b3 = slab[4, :K2]
    b4 = slab[5, :D]

    # Single relayout: (TB, P*H*D) -> (P, N, D), n = b*H + h.  Token mixing
    # contracts the leading P dim; LayerNorm / channel mixing contract D.
    x = x_ref[...].astype(jnp.float32).reshape(TB, P, H, D)
    x = jnp.transpose(x, (1, 0, 2, 3)).reshape(P, N, D)

    # ---- LayerNorm 1 (biased variance over D, no bias term), one pass ----
    mu = jnp.sum(x, axis=-1, keepdims=True) * inv_d
    var = jnp.sum(x * x, axis=-1, keepdims=True) * inv_d - mu * mu
    x1 = (x - mu) * jax.lax.rsqrt(var + EPS1) * g1                  # (P, N, D)

    # ---- Token-mixing MLP: contract P, weight-stationary 2D MXU matmuls ----
    x1_2d = x1.reshape(P, N * D)
    h1 = jnp.dot(w1_ref[...], x1_2d,
                 preferred_element_type=jnp.float32) + b1[:, None]  # (K1, N*D)
    h1 = jnp.maximum(h1, 0.0)
    # TODO(synk): nn.Dropout(dropout_rate=0.0) is identity; not implemented.
    tok = jnp.dot(w2_ref[...], h1,
                  preferred_element_type=jnp.float32) + b2[:, None]  # (P, N*D)
    x = x + tok.reshape(P, N, D)

    # ---- LayerNorm 2 (over D), one pass ----
    mu = jnp.sum(x, axis=-1, keepdims=True) * inv_d
    var = jnp.sum(x * x, axis=-1, keepdims=True) * inv_d - mu * mu
    x2 = (x - mu) * jax.lax.rsqrt(var + EPS2) * g2                  # (P, N, D)

    # ---- Channel-mixing MLP: contract D, one (P*N, D) matmul per layer ----
    x2r = x2.reshape(P * N, D)
    h2 = jnp.dot(x2r, w3t_ref[...],
                 preferred_element_type=jnp.float32) + b3            # (P*N, K2)
    h2 = jnp.maximum(h2, 0.0)
    chan = jnp.dot(h2, w4t_ref[...],
                   preferred_element_type=jnp.float32) + b4          # (P*N, D)
    x = x + chan.reshape(P, N, D)

    # Inverse relayout and one lane-dense (TB, P*H*D) store.
    out = jnp.transpose(x.reshape(P, TB, H, D), (1, 0, 2, 3))
    o_ref[...] = out.reshape(TB, P * H * D).astype(o_ref.dtype)


# ----------------------------------------------------------------------------
# Layout-conservative fallback (op/layout patterns proven in the prior version)
# ----------------------------------------------------------------------------
def _mixer_kernel_compat(x_ref, slab_ref, w1_ref, w2_ref, w3t_ref, w4t_ref,
                         o_ref, *, P, H, D, K1, K2):
    TB = x_ref.shape[0]
    N = TB * H
    inv_d = 1.0 / D

    slab = slab_ref[...]
    g1 = slab[0, :D]
    b1 = slab[1, :K1]
    b2 = slab[2, :P]
    g2 = slab[3, :D]
    b3 = slab[4, :K2]
    b4 = slab[5, :D]

    x = jnp.concatenate([x_ref[:, :, h, :] for h in range(H)], axis=0)
    x = x.astype(jnp.float32)                                       # (N, P, D)

    mu = jnp.sum(x, axis=-1, keepdims=True) * inv_d
    var = jnp.sum(x * x, axis=-1, keepdims=True) * inv_d - mu * mu
    x1 = (x - mu) * jax.lax.rsqrt(var + EPS1) * g1

    w1b = jnp.broadcast_to(w1_ref[...], (N, K1, P))
    w2b = jnp.broadcast_to(w2_ref[...], (N, P, K1))
    h1 = jnp.einsum('nkp,npd->nkd', w1b, x1,
                    preferred_element_type=jnp.float32) + b1[:, None]
    h1 = jnp.maximum(h1, 0.0)
    tok = jnp.einsum('npk,nkd->npd', w2b, h1,
                     preferred_element_type=jnp.float32) + b2[:, None]
    x = x + tok

    mu = jnp.sum(x, axis=-1, keepdims=True) * inv_d
    var = jnp.sum(x * x, axis=-1, keepdims=True) * inv_d - mu * mu
    x2 = (x - mu) * jax.lax.rsqrt(var + EPS2) * g2

    h2 = jnp.maximum(jnp.dot(x2.reshape(N * P, D), w3t_ref[...],
                             preferred_element_type=jnp.float32) + b3, 0.0)
    chan = jnp.dot(h2, w4t_ref[...],
                   preferred_element_type=jnp.float32) + b4
    x = x + chan.reshape(N, P, D)

    out = x.astype(o_ref.dtype)
    for h in range(H):
        o_ref[:, :, h, :] = out[h * TB:(h + 1) * TB]


# ----------------------------------------------------------------------------
# Tiling / VMEM budgeting (generation-aware via get_tpu_info)
# ----------------------------------------------------------------------------
def _choose_tiling(B, P, H, D, K1, K2):
    try:
        vmem_cap = int(pltpu.get_tpu_info().vmem_capacity_bytes)
    except Exception:                      # noqa: BLE001 — conservative default
        vmem_cap = 64 * 1024 * 1024        # v7x per-TensorCore size (smallest)
    budget = int(vmem_cap * 0.4)

    def step_bytes(tb):
        blk = 4 * tb * P * H * D                       # one f32 data block
        io = 2 * 2 * blk                               # double-buffered in+out
        h1 = 4 * tb * H * K1 * D                       # (K1, N*D) hidden
        h2 = 4 * tb * H * P * K2                       # (P*N, K2) hidden
        tmp = 8 * blk + 2 * h1 + 2 * h2                # live f32 temporaries
        wts = 2 * 4 * (K1 * P + P * K1 + D * K2 + K2 * D + 8 * 128)
        return io + tmp + wts

    def pick(require_even_grid):
        for cand in range(B, 0, -1):
            if B % cand:
                continue
            g = B // cand
            if g < 2 or (require_even_grid and g % 2):
                continue
            if step_bytes(cand) <= budget:
                return cand
        return None

    tb = pick(True) or pick(False) or 1    # prefer an even grid (v7x: 2 TCs)
    vmem_limit = min(max(32 * 1024 * 1024, 2 * step_bytes(tb)),
                     int(vmem_cap * 0.75))
    return tb, int(vmem_limit)


# ----------------------------------------------------------------------------
# Wrapper
# ----------------------------------------------------------------------------
def mlp_mixer_layer(x, params, tb=None):
    """x: (B, P, H, D) with P = num_patches, D = in_dim (PyTorch NCHW)."""
    g1, w1, b1, w2, b2, g2, w3, b3, w4, b4 = params
    B, P, H, D = x.shape
    K1 = w1.shape[0]
    K2 = w3.shape[0]
    PHD = P * H * D

    auto_tb, vmem_limit = _choose_tiling(B, P, H, D, K1, K2)
    tb = auto_tb if tb is None else tb
    assert B % tb == 0, (B, tb)

    # Pack the six tiny gamma/bias vectors into one lane-oriented slab.
    L = max(128, D, K1, K2, P)
    L = ((L + 127) // 128) * 128
    slab = jnp.zeros((8, L), jnp.float32)
    slab = slab.at[0, :D].set(g1.astype(jnp.float32))
    slab = slab.at[1, :K1].set(b1.astype(jnp.float32))
    slab = slab.at[2, :P].set(b2.astype(jnp.float32))
    slab = slab.at[3, :D].set(g2.astype(jnp.float32))
    slab = slab.at[4, :K2].set(b3.astype(jnp.float32))
    slab = slab.at[5, :D].set(b4.astype(jnp.float32))

    w3t = w3.T                      # (D, K2)
    w4t = w4.T                      # (K2, D)

    cparams = pltpu.CompilerParams(
        dimension_semantics=("parallel",),
        vmem_limit_bytes=vmem_limit)

    def full(shape):
        return pl.BlockSpec(shape, lambda i: (0,) * len(shape))

    common_specs = [full((8, L)),                    # packed gammas/biases
                    full((K1, P)), full((P, K1)),    # token-mixing weights
                    full((D, K2)), full((K2, D))]    # channel-mixing weights^T

    def run_fast():
        kern = functools.partial(_mixer_kernel_fast, P=P, H=H, D=D, K1=K1, K2=K2)
        out = pl.pallas_call(
            kern,
            out_shape=jax.ShapeDtypeStruct((B, PHD), x.dtype),
            grid=(B // tb,),
            in_specs=[pl.BlockSpec((tb, PHD), lambda i: (i, 0))] + common_specs,
            out_specs=pl.BlockSpec((tb, PHD), lambda i: (i, 0)),
            input_output_aliases={0: 0},
            compiler_params=cparams,
        )(x.reshape(B, PHD), slab, w1, w2, w3t, w4t)
        return out.reshape(B, P, H, D)

    def run_compat():
        kern = functools.partial(_mixer_kernel_compat, P=P, H=H, D=D, K1=K1, K2=K2)
        return pl.pallas_call(
            kern,
            out_shape=jax.ShapeDtypeStruct((B, P, H, D), x.dtype),
            grid=(B // tb,),
            in_specs=[pl.BlockSpec((tb, P, H, D), lambda i: (i, 0, 0, 0))]
                     + common_specs,
            out_specs=pl.BlockSpec((tb, P, H, D), lambda i: (i, 0, 0, 0)),
            input_output_aliases={0: 0},
            compiler_params=cparams,
        )(x, slab, w1, w2, w3t, w4t)

    try:
        return run_fast()
    except Exception:   # noqa: BLE001 — Mosaic build lacks a relayout pattern
        return run_compat()


# ----------------------------------------------------------------------------
# Pure-JAX reference mirroring the PyTorch forward exactly
# ----------------------------------------------------------------------------
def reference(x, params):
    g1, w1, b1, w2, b2, g2, w3, b3, w4, b4 = params

    def ln(v, g, eps):
        mu = v.mean(-1, keepdims=True)
        var = ((v - mu) ** 2).mean(-1, keepdims=True)
        return (v - mu) / jnp.sqrt(var + eps) * g

    x1 = ln(x, g1, EPS1)
    h = jax.nn.relu(jnp.einsum('kp,bphd->bkhd', w1, x1)
                    + b1[None, :, None, None])
    x = x + jnp.einsum('pk,bkhd->bphd', w2, h) + b2[None, :, None, None]

    x2 = ln(x, g2, EPS2)
    h2 = jax.nn.relu(jnp.einsum('md,bphd->bphm', w3, x2) + b3)
    x = x + jnp.einsum('dm,bphm->bphd', w4, h2) + b4
    return x


if __name__ == "__main__":
    # Small shapes: batch=2, num_patches=8, H=4, in_dim=16, hidden1=hidden2=32
    B, P, H, D = 2, 8, 4, 16
    K1, K2 = 32, 32

    key = jax.random.PRNGKey(0)
    keys = jax.random.split(key, 9)
    x = jax.random.normal(keys[0], (B, P, H, D), jnp.float32)

    scale = 0.1
    g1 = jnp.ones((D,), jnp.float32)        # LayerNorm weight default init
    g2 = jnp.ones((D,), jnp.float32)
    w1 = jax.random.normal(keys[1], (K1, P), jnp.float32) * scale
    b1 = jax.random.normal(keys[2], (K1,), jnp.float32) * scale
    w2 = jax.random.normal(keys[3], (P, K1), jnp.float32) * scale
    b2 = jax.random.normal(keys[4], (P,), jnp.float32) * scale
    w3 = jax.random.normal(keys[5], (K2, D), jnp.float32) * scale
    b3 = jax.random.normal(keys[6], (K2,), jnp.float32) * scale
    w4 = jax.random.normal(keys[7], (D, K2), jnp.float32) * scale
    b4 = jax.random.normal(keys[8], (D,), jnp.float32) * scale
    params = (g1, w1, b1, w2, b2, g2, w3, b3, w4, b4)

    ref = reference(x, params)              # computed before the kernel call
    out = jax.block_until_ready(mlp_mixer_layer(x, params))
    err = float(jnp.max(jnp.abs(out - ref)))
    assert out.shape == (B, P, H, D)
    assert jnp.allclose(out, ref, atol=2e-4, rtol=2e-4), f"max abs err {err}"
    print("KERNEL_OK")
</pallas_src>

<mosaic_0001>
module attributes {stable_mosaic.version = 11 : i64} {
  func.func @_mixer_kernel_compat(%arg0: i32, %arg1: memref<1x8x4x16xf32, #tpu.memory_space<vmem>>, %arg2: memref<8x128xf32, #tpu.memory_space<vmem>>, %arg3: memref<32x8xf32, #tpu.memory_space<vmem>>, %arg4: memref<8x32xf32, #tpu.memory_space<vmem>>, %arg5: memref<16x32xf32, #tpu.memory_space<vmem>>, %arg6: memref<32x16xf32, #tpu.memory_space<vmem>>, %arg7: memref<1x8x4x16xf32, #tpu.memory_space<vmem>>) attributes {dimension_semantics = [#tpu.dimension_semantics<parallel>], iteration_bounds = array<i64: 2>, scalar_prefetch = 0 : i64, scratch_operands = 0 : i64, tpu.core_type = #tpu.core_type<tc>, window_params = [{transform_indices = @transform_0, window_bounds = array<i64: 1, 8, 4, 16>}, {pipeline_mode = #tpu.pipeline_mode<synchronous>, transform_indices = @transform_1, window_bounds = array<i64: 8, 128>}, {pipeline_mode = #tpu.pipeline_mode<synchronous>, transform_indices = @transform_2, window_bounds = array<i64: 32, 8>}, {pipeline_mode = #tpu.pipeline_mode<synchronous>, transform_indices = @transform_3, window_bounds = array<i64: 8, 32>}, {pipeline_mode = #tpu.pipeline_mode<synchronous>, transform_indices = @transform_4, window_bounds = array<i64: 16, 32>}, {pipeline_mode = #tpu.pipeline_mode<synchronous>, transform_indices = @transform_5, window_bounds = array<i64: 32, 16>}, {transform_indices = @transform_6, window_bounds = array<i64: 1, 8, 4, 16>}]} {
    %c0 = arith.constant 0 : index
    %c0_0 = arith.constant 0 : index
    %0 = vector.load %arg2[%c0, %c0_0] : memref<8x128xf32, #tpu.memory_space<vmem>>, vector<8x128xf32>
    %1 = vector.extract_strided_slice %0 {offsets = [0, 0], sizes = [1, 16], strides = [1, 1]} : vector<8x128xf32> to vector<1x16xf32>
    %2 = vector.shape_cast %1 : vector<1x16xf32> to vector<16xf32>
    %3 = vector.extract_strided_slice %0 {offsets = [1, 0], sizes = [1, 32], strides = [1, 1]} : vector<8x128xf32> to vector<1x32xf32>
    %4 = vector.shape_cast %3 : vector<1x32xf32> to vector<32xf32>
    %5 = vector.extract_strided_slice %0 {offsets = [2, 0], sizes = [1, 8], strides = [1, 1]} : vector<8x128xf32> to vector<1x8xf32>
    %6 = vector.shape_cast %5 : vector<1x8xf32> to vector<8xf32>
    %7 = vector.extract_strided_slice %0 {offsets = [3, 0], sizes = [1, 16], strides = [1, 1]} : vector<8x128xf32> to vector<1x16xf32>
    %8 = vector.shape_cast %7 : vector<1x16xf32> to vector<16xf32>
    %9 = vector.extract_strided_slice %0 {offsets = [4, 0], sizes = [1, 32], strides = [1, 1]} : vector<8x128xf32> to vector<1x32xf32>
    %10 = vector.shape_cast %9 : vector<1x32xf32> to vector<32xf32>
    %11 = vector.extract_strided_slice %0 {offsets = [5, 0], sizes = [1, 16], strides = [1, 1]} : vector<8x128xf32> to vector<1x16xf32>
    %12 = vector.shape_cast %11 : vector<1x16xf32> to vector<16xf32>
    %c0_1 = arith.constant 0 : index
    %c0_2 = arith.constant 0 : index
    %c0_3 = arith.constant 0 : index
    %c0_4 = arith.constant 0 : index
    %13 = vector.load %arg1[%c0_1, %c0_2, %c0_3, %c0_4] : memref<1x8x4x16xf32, #tpu.memory_space<vmem>>, vector<1x8x1x16xf32>
    %14 = vector.shape_cast %13 : vector<1x8x1x16xf32> to vector<1x8x16xf32>
    %c0_5 = arith.constant 0 : index
    %c0_6 = arith.constant 0 : index
    %c1 = arith.constant 1 : index
    %c0_7 = arith.constant 0 : index
    %15 = vector.load %arg1[%c0_5, %c0_6, %c1, %c0_7] : memref<1x8x4x16xf32, #tpu.memory_space<vmem>>, vector<1x8x1x16xf32>
    %16 = vector.shape_cast %15 : vector<1x8x1x16xf32> to vector<1x8x16xf32>
    %c0_8 = arith.constant 0 : index
    %c0_9 = arith.constant 0 : index
    %c2 = arith.constant 2 : index
    %c0_10 = arith.constant 0 : index
    %17 = vector.load %arg1[%c0_8, %c0_9, %c2, %c0_10] : memref<1x8x4x16xf32, #tpu.memory_space<vmem>>, vector<1x8x1x16xf32>
    %18 = vector.shape_cast %17 : vector<1x8x1x16xf32> to vector<1x8x16xf32>
    %c0_11 = arith.constant 0 : index
    %c0_12 = arith.constant 0 : index
    %c3 = arith.constant 3 : index
    %c0_13 = arith.constant 0 : index
    %19 = vector.load %arg1[%c0_11, %c0_12, %c3, %c0_13] : memref<1x8x4x16xf32, #tpu.memory_space<vmem>>, vector<1x8x1x16xf32>
    %20 = vector.shape_cast %19 : vector<1x8x1x16xf32> to vector<1x8x16xf32>
    %21 = tpu.concatenate %14, %16, %18, %20 in 0 : vector<1x8x16xf32>, vector<1x8x16xf32>, vector<1x8x16xf32>, vector<1x8x16xf32> -> vector<4x8x16xf32>
    %cst = arith.constant dense<0.000000e+00> : vector<4x8xf32>
    %22 = vector.multi_reduction <add>, %21, %cst [2] : vector<4x8x16xf32> to vector<4x8xf32>
    %23 = vector.shape_cast %22 : vector<4x8xf32> to vector<4x8x1xf32>
    %cst_14 = arith.constant 6.250000e-02 : f32
    %24 = vector.broadcast %cst_14 : f32 to vector<4x8x1xf32>
    %25 = arith.mulf %23, %24 : vector<4x8x1xf32>
    %26 = arith.mulf %21, %21 : vector<4x8x16xf32>
    %cst_15 = arith.constant dense<0.000000e+00> : vector<4x8xf32>
    %27 = vector.multi_reduction <add>, %26, %cst_15 [2] : vector<4x8x16xf32> to vector<4x8xf32>
    %28 = vector.shape_cast %27 : vector<4x8xf32> to vector<4x8x1xf32>
    %cst_16 = arith.constant 6.250000e-02 : f32
    %29 = vector.broadcast %cst_16 : f32 to vector<4x8x1xf32>
    %30 = arith.mulf %28, %29 : vector<4x8x1xf32>
    %31 = arith.mulf %25, %25 : vector<4x8x1xf32>
    %32 = arith.subf %30, %31 : vector<4x8x1xf32>
    %33 = vector.broadcast %25 : vector<4x8x1xf32> to vector<4x8x16xf32>
    %34 = arith.subf %21, %33 : vector<4x8x16xf32>
    %cst_17 = arith.constant 1.01327896E-6 : f32
    %35 = vector.broadcast %cst_17 : f32 to vector<4x8x1xf32>
    %36 = arith.addf %32, %35 : vector<4x8x1xf32>
    %37 = math.rsqrt %36 : vector<4x8x1xf32>
    %38 = vector.broadcast %37 : vector<4x8x1xf32> to vector<4x8x16xf32>
    %39 = arith.mulf %34, %38 : vector<4x8x16xf32>
    %40 = vector.shape_cast %2 : vector<16xf32> to vector<1x1x16xf32>
    %41 = vector.broadcast %40 : vector<1x1x16xf32> to vector<4x8x16xf32>
    %42 = arith.mulf %39, %41 : vector<4x8x16xf32>
    %c0_18 = arith.constant 0 : index
    %c0_19 = arith.constant 0 : index
    %43 = vector.load %arg3[%c0_18, %c0_19] : memref<32x8xf32, #tpu.memory_space<vmem>>, vector<32x8xf32>
    %44 = vector.shape_cast %43 : vector<32x8xf32> to vector<1x32x8xf32>
    %45 = vector.broadcast %44 : vector<1x32x8xf32> to vector<4x32x8xf32>
    %c0_20 = arith.constant 0 : index
    %c0_21 = arith.constant 0 : index
    %46 = vector.load %arg4[%c0_20, %c0_21] : memref<8x32xf32, #tpu.memory_space<vmem>>, vector<8x32xf32>
    %47 = vector.shape_cast %46 : vector<8x32xf32> to vector<1x8x32xf32>
    %48 = vector.broadcast %47 : vector<1x8x32xf32> to vector<4x8x32xf32>
    "tpu.trace_start"() <{level = 10 : i32, message = "nkp,npd->nkd"}> : () -> ()
    %cst_22 = arith.constant dense<0.000000e+00> : vector<4x32x16xf32>
    %49 = tpu.matmul %45, %42, %cst_22 {dimension_numbers = #tpu.dot_dimension_numbers<[2], [1], [1], [2], [0, 0, 0, 1, 1, 2], [0], [0]>} : vector<4x32x8xf32>, vector<4x8x16xf32>, vector<4x32x16xf32> -> vector<4x32x16xf32>
    "tpu.trace_stop"() : () -> ()
    %50 = vector.shape_cast %4 : vector<32xf32> to vector<32x1xf32>
    %51 = vector.shape_cast %50 : vector<32x1xf32> to vector<1x32x1xf32>
    %52 = vector.broadcast %51 : vector<1x32x1xf32> to vector<4x32x16xf32>
    %53 = arith.addf %49, %52 : vector<4x32x16xf32>
    %cst_23 = arith.constant 0.000000e+00 : f32
    %54 = vector.broadcast %cst_23 : f32 to vector<4x32x16xf32>
    %55 = arith.maximumf %53, %54 : vector<4x32x16xf32>
    "tpu.trace_start"() <{level = 10 : i32, message = "npk,nkd->npd"}> : () -> ()
    %cst_24 = arith.constant dense<0.000000e+00> : vector<4x8x16xf32>
    %56 = tpu.matmul %48, %55, %cst_24 {dimension_numbers = #tpu.dot_dimension_numbers<[2], [1], [1], [2], [0, 0, 0, 1, 1, 2], [0], [0]>} : vector<4x8x32xf32>, vector<4x32x16xf32>, vector<4x8x16xf32> -> vector<4x8x16xf32>
    "tpu.trace_stop"() : () -> ()
    %57 = vector.shape_cast %6 : vector<8xf32> to vector<8x1xf32>
    %58 = vector.shape_cast %57 : vector<8x1xf32> to vector<1x8x1xf32>
    %59 = vector.broadcast %58 : vector<1x8x1xf32> to vector<4x8x16xf32>
    %60 = arith.addf %56, %59 : vector<4x8x16xf32>
    %61 = arith.addf %21, %60 : vector<4x8x16xf32>
    %cst_25 = arith.constant dense<0.000000e+00> : vector<4x8xf32>
    %62 = vector.multi_reduction <add>, %61, %cst_25 [2] : vector<4x8x16xf32> to vector<4x8xf32>
    %63 = vector.shape_cast %62 : vector<4x8xf32> to vector<4x8x1xf32>
    %cst_26 = arith.constant 6.250000e-02 : f32
    %64 = vector.broadcast %cst_26 : f32 to vector<4x8x1xf32>
    %65 = arith.mulf %63, %64 : vector<4x8x1xf32>
    %66 = arith.mulf %61, %61 : vector<4x8x16xf32>
    %cst_27 = arith.constant dense<0.000000e+00> : vector<4x8xf32>
    %67 = vector.multi_reduction <add>, %66, %cst_27 [2] : vector<4x8x16xf32> to vector<4x8xf32>
    %68 = vector.shape_cast %67 : vector<4x8xf32> to vector<4x8x1xf32>
    %cst_28 = arith.constant 6.250000e-02 : f32
    %69 = vector.broadcast %cst_28 : f32 to vector<4x8x1xf32>
    %70 = arith.mulf %68, %69 : vector<4x8x1xf32>
    %71 = arith.mulf %65, %65 : vector<4x8x1xf32>
    %72 = arith.subf %70, %71 : vector<4x8x1xf32>
    %73 = vector.broadcast %65 : vector<4x8x1xf32> to vector<4x8x16xf32>
    %74 = arith.subf %61, %73 : vector<4x8x16xf32>
    %cst_29 = arith.constant 1.01327896E-6 : f32
    %75 = vector.broadcast %cst_29 : f32 to vector<4x8x1xf32>
    %76 = arith.addf %72, %75 : vector<4x8x1xf32>
    %77 = math.rsqrt %76 : vector<4x8x1xf32>
    %78 = vector.broadcast %77 : vector<4x8x1xf32> to vector<4x8x16xf32>
    %79 = arith.mulf %74, %78 : vector<4x8x16xf32>
    %80 = vector.shape_cast %8 : vector<16xf32> to vector<1x1x16xf32>
    %81 = vector.broadcast %80 : vector<1x1x16xf32> to vector<4x8x16xf32>
    %82 = arith.mulf %79, %81 : vector<4x8x16xf32>
    %83 = vector.shape_cast %82 : vector<4x8x16xf32> to vector<32x16xf32>
    %c0_30 = arith.constant 0 : index
    %c0_31 = arith.constant 0 : index
    %84 = vector.load %arg5[%c0_30, %c0_31] : memref<16x32xf32, #tpu.memory_space<vmem>>, vector<16x32xf32>
    %cst_32 = arith.constant dense<0.000000e+00> : vector<32x32xf32>
    %85 = tpu.matmul %83, %84, %cst_32 {dimension_numbers = #tpu.dot_dimension_numbers<[1], [0], [0], [1], [0, 0, 1, 1], [], []>} : vector<32x16xf32>, vector<16x32xf32>, vector<32x32xf32> -> vector<32x32xf32>
    %86 = vector.shape_cast %10 : vector<32xf32> to vector<1x32xf32>
    %87 = vector.broadcast %86 : vector<1x32xf32> to vector<32x32xf32>
    %88 = arith.addf %85, %87 : vector<32x32xf32>
    %cst_33 = arith.constant 0.000000e+00 : f32
    %89 = vector.broadcast %cst_33 : f32 to vector<32x32xf32>
    %90 = arith.maximumf %88, %89 : vector<32x32xf32>
    %c0_34 = arith.constant 0 : index
    %c0_35 = arith.constant 0 : index
    %91 = vector.load %arg6[%c0_34, %c0_35] : memref<32x16xf32, #tpu.memory_space<vmem>>, vector<32x16xf32>
    %cst_36 = arith.constant dense<0.000000e+00> : vector<32x16xf32>
    %92 = tpu.matmul %90, %91, %cst_36 {dimension_numbers = #tpu.dot_dimension_numbers<[1], [0], [0], [1], [0, 0, 1, 1], [], []>} : vector<32x32xf32>, vector<32x16xf32>, vector<32x16xf32> -> vector<32x16xf32>
    %93 = vector.shape_cast %12 : vector<16xf32> to vector<1x16xf32>
    %94 = vector.broadcast %93 : vector<1x16xf32> to vector<32x16xf32>
    %95 = arith.addf %92, %94 : vector<32x16xf32>
    %96 = vector.shape_cast %95 : vector<32x16xf32> to vector<4x8x16xf32>
    %97 = arith.addf %61, %96 : vector<4x8x16xf32>
    %98 = vector.extract_strided_slice %97 {offsets = [0, 0, 0], sizes = [1, 8, 16], strides = [1, 1, 1]} : vector<4x8x16xf32> to vector<1x8x16xf32>
    %c0_37 = arith.constant 0 : index
    %c0_38 = arith.constant 0 : index
    %c0_39 = arith.constant 0 : index
    %c0_40 = arith.constant 0 : index
    %99 = vector.load %arg7[%c0_37, %c0_38, %c0_39, %c0_40] : memref<1x8x4x16xf32, #tpu.memory_space<vmem>>, vector<1x8x1x16xf32>
    %100 = vector.shape_cast %99 : vector<1x8x1x16xf32> to vector<1x8x16xf32>
    %101 = vector.shape_cast %98 : vector<1x8x16xf32> to vector<1x8x1x16xf32>
    tpu.vector_store %arg7[%c0_37, %c0_38, %c0_39, %c0_40], %101 {strides = array<i32>} : memref<1x8x4x16xf32, #tpu.memory_space<vmem>>, vector<1x8x1x16xf32>,
    %102 = vector.extract_strided_slice %97 {offsets = [1, 0, 0], sizes = [1, 8, 16], strides = [1, 1, 1]} : vector<4x8x16xf32> to vector<1x8x16xf32>
    %c0_41 = arith.constant 0 : index
    %c0_42 = arith.constant 0 : index
    %c1_43 = arith.constant 1 : index
    %c0_44 = arith.constant 0 : index
    %103 = vector.load %arg7[%c0_41, %c0_42, %c1_43, %c0_44] : memref<1x8x4x16xf32, #tpu.memory_space<vmem>>, vector<1x8x1x16xf32>
    %104 = vector.shape_cast %103 : vector<1x8x1x16xf32> to vector<1x8x16xf32>
    %105 = vector.shape_cast %102 : vector<1x8x16xf32> to vector<1x8x1x16xf32>
    tpu.vector_store %arg7[%c0_41, %c0_42, %c1_43, %c0_44], %105 {strides = array<i32>} : memref<1x8x4x16xf32, #tpu.memory_space<vmem>>, vector<1x8x1x16xf32>,
    %106 = vector.extract_strided_slice %97 {offsets = [2, 0, 0], sizes = [1, 8, 16], strides = [1, 1, 1]} : vector<4x8x16xf32> to vector<1x8x16xf32>
    %c0_45 = arith.constant 0 : index
    %c0_46 = arith.constant 0 : index
    %c2_47 = arith.constant 2 : index
    %c0_48 = arith.constant 0 : index
    %107 = vector.load %arg7[%c0_45, %c0_46, %c2_47, %c0_48] : memref<1x8x4x16xf32, #tpu.memory_space<vmem>>, vector<1x8x1x16xf32>
    %108 = vector.shape_cast %107 : vector<1x8x1x16xf32> to vector<1x8x16xf32>
    %109 = vector.shape_cast %106 : vector<1x8x16xf32> to vector<1x8x1x16xf32>
    tpu.vector_store %arg7[%c0_45, %c0_46, %c2_47, %c0_48], %109 {strides = array<i32>} : memref<1x8x4x16xf32, #tpu.memory_space<vmem>>, vector<1x8x1x16xf32>,
    %110 = vector.extract_strided_slice %97 {offsets = [3, 0, 0], sizes = [1, 8, 16], strides = [1, 1, 1]} : vector<4x8x16xf32> to vector<1x8x16xf32>
    %c0_49 = arith.constant 0 : index
    %c0_50 = arith.constant 0 : index
    %c3_51 = arith.constant 3 : index
    %c0_52 = arith.constant 0 : index
    %111 = vector.load %arg7[%c0_49, %c0_50, %c3_51, %c0_52] : memref<1x8x4x16xf32, #tpu.memory_space<vmem>>, vector<1x8x1x16xf32>
    %112 = vector.shape_cast %111 : vector<1x8x1x16xf32> to vector<1x8x16xf32>
    %113 = vector.shape_cast %110 : vector<1x8x16xf32> to vector<1x8x1x16xf32>
    tpu.vector_store %arg7[%c0_49, %c0_50, %c3_51, %c0_52], %113 {strides = array<i32>} : memref<1x8x4x16xf32, #tpu.memory_space<vmem>>, vector<1x8x1x16xf32>,
    return
  }
  func.func @transform_0(%arg0: i32) -> (i32, i32, i32, i32) {
    %c0_i32 = arith.constant 0 : i32
    %c0_i32_0 = arith.constant 0 : i32
    %c0_i32_1 = arith.constant 0 : i32
    %c0_i32_2 = arith.constant 0 : i32
    return %arg0, %c0_i32, %c0_i32_0, %c0_i32_1 : i32, i32, i32, i32
  }
  func.func @transform_1(%arg0: i32) -> (i32, i32) {
    %c0_i32 = arith.constant 0 : i32
    %c0_i32_0 = arith.constant 0 : i32
    %c0_i32_1 = arith.constant 0 : i32
    return %c0_i32, %c0_i32_0 : i32, i32
  }
  func.func @transform_2(%arg0: i32) -> (i32, i32) {
    %c0_i32 = arith.constant 0 : i32
    %c0_i32_0 = arith.constant 0 : i32
    %c0_i32_1 = arith.constant 0 : i32
    return %c0_i32, %c0_i32_0 : i32, i32
  }
  func.func @transform_3(%arg0: i32) -> (i32, i32) {
    %c0_i32 = arith.constant 0 : i32
    %c0_i32_0 = arith.constant 0 : i32
    %c0_i32_1 = arith.constant 0 : i32
    return %c0_i32, %c0_i32_0 : i32, i32
  }
  func.func @transform_4(%arg0: i32) -> (i32, i32) {
    %c0_i32 = arith.constant 0 : i32
    %c0_i32_0 = arith.constant 0 : i32
    %c0_i32_1 = arith.constant 0 : i32
    return %c0_i32, %c0_i32_0 : i32, i32
  }
  func.func @transform_5(%arg0: i32) -> (i32, i32) {
    %c0_i32 = arith.constant 0 : i32
    %c0_i32_0 = arith.constant 0 : i32
    %c0_i32_1 = arith.constant 0 : i32
    return %c0_i32, %c0_i32_0 : i32, i32
  }
  func.func @transform_6(%arg0: i32) -> (i32, i32, i32, i32) {
    %c0_i32 = arith.constant 0 : i32
    %c0_i32_0 = arith.constant 0 : i32
    %c0_i32_1 = arith.constant 0 : i32
    %c0_i32_2 = arith.constant 0 : i32
    return %arg0, %c0_i32, %c0_i32_0, %c0_i32_1 : i32, i32, i32, i32
  }
}

</mosaic_0001>

<bundles_post_ra>
// kernel: tpu_custom_call.1
= control target key start
LH: loop header
LB: loop body
LE: loop exit
PB: predicated region body
PF: predicated region fallthrough
CT: control target
= control target key end

     0   :  { %11 = vsyncpa [#allocation3], 0  ;;  %s4460_s0 = inlined_call_operand.hbm [shape: f32[2,8,4,16], index: 0, kind: input, shape index: {}, may-alias: {0,6}]   ;;  %s4461_s1 = inlined_call_operand.vmem [shape: f32[8,128], index: 1, kind: input, shape index: {}]   ;;  %s4462_s2 = inlined_call_operand.vmem [shape: f32[32,8], index: 2, kind: input, shape index: {}]   ;;  %s4463_s3 = inlined_call_operand.vmem [shape: f32[8,32], index: 3, kind: input, shape index: {}]   ;;  %s4464_s4 = inlined_call_operand.vmem [shape: f32[16,32], index: 4, kind: input, shape index: {}]   ;;  %s4465_s5 = inlined_call_operand.vmem [shape: f32[32,16], index: 5, kind: input, shape index: {}]   ;;  %s4466_s6 = inlined_call_operand.hbm [shape: f32[2,8,4,16], index: 6, kind: output, shape index: {}, may-alias: {0,6}]  }
   0x1   :  { %13 = vsyncpa [#allocation3 + $0x1], 0 }
   0x2   :  { %14 = vsyncpa [#allocation4], 0 }
   0x3   :  { %16 = vsyncpa [#allocation4 + $0x1], 0  ;;  %s3115_s21 = smov 0   ;;  %s3117_s22 = smov 0  }
   0x4   :  { %s3119_s23 = smov 0   ;;  %s3121_s24 = smov 0  }
   0x5 LB: > { %s3136_s25 = sadd.s32 4294967295, %s3070_s24   ;;  %s2679_s26 = sadd.s32 4294967294, %s3070_s24   ;;  %s3070_s24 = sphi %s3121_s24, %s4542_s24   ;;  %s3066_s23 = sphi %s3119_s23, %s4541_s23   ;;  %s3062_s22 = sphi %s3117_s22, %s4540_s22   ;;  %s3058_s21 = sphi %s3115_s21, %s4539_s21  }
   0x6   : > { %s3140_s27 = sadd.s32 1, %s3070_s24   ;;  %s29_s28 = sadd.s32 1, %s3066_s23 }
   0x7   : > { %s26_s29 = ssub.s32 %s3070_s24, %s3140_s27  ;;  %p36_p0 = scmp.ne.s32.totalorder %s3066_s23, %s3062_s22 }
   0x8   : > { %p27_p1 = scmp.eq.s32.totalorder %s26_s29, 0  ;;  %p37_p2 = scmp.eq.s32.totalorder %s3070_s24, 0 }
   0x9   : > { %p42_p3 = scmp.ne.s32.totalorder %s3062_s22, %s3058_s21  ;;  %p43_p4 = scmp.eq.s32.totalorder %s3136_s25, 0 }
   0xa   : > { %s3152_s30 = scalar_select %p27_p1, %s3066_s23, %s29_s28  }
   0xb   : > { %p3154_p5 = por %p37_p2, %p36_p0  ;;  %p3158_p6 = por %p43_p4, %p42_p3 }
   0xc   : > { %p171_p7 = scmp.eq.s32.totalorder %s3136_s25, 1  ;;  %p177_p8 = scmp.eq.s32.totalorder %s2679_s26, 1 }
   0xd   : > { %s4489_s8 = scalar_select %p3158_p6, 1, 0 }
   0xe   : > { %p2889_p10 = scmp.lt.s32.totalorder %s3070_s24, 2  ;;  %p3165_p11 = por %p171_p7, %p36_p0 }
   0xf   : > { %p3169_p12 = por %p177_p8, %p42_p3  ;;  %s212_s11 = sand.u32 1, %s3066_s23  }
  0x10   : > { %s4490_s9 = scalar_select %p3165_p11, 1, 0 }
  0x11   : > { %s4491_s10 = scalar_select %p3169_p12, 1, 0 }
  0x12   : > { %s2721_s12 = sshll.u32 %s3070_s24, 9  ;;  %s2682_s13 = sshll.u32 %s212_s11, 5 }
  0x13   : > { %s3178_s16 = scalar_lea.hbm %s4460_s0, %s2721_s12  ;;  %s216_s17 = scalar_lea.vmem [#allocation2], %s2682_s13 }
  0x14   : > { %s223_s18 = sshll.u32 %s216_s17, 4  ;;  %p3182_p13 = pnand %p2889_p10, %p3154_p5  ;;  %s3186_s18 = int_to_ptr.vmem [resolvable:$true] %s223_s18 }
  0x15   : > { %s3188_s20 = scalar_lea.sflag [#allocation3], %s212_s11  ;;  %s2978_s26 = scalar_lea.hbm %s3178_s16, 512 }
  0x16   : > { %p2979_p0 = scmp.ne.s32.totalorder %s3178_s16, %s2978_s26  ;;  %p2980_p1 = pneg %p3182_p13 }
  0x17   : > { %s2983_s12 = scalar_lea.hbm %s4460_s0, 1024  ;;  %p2984_p4 = scmp.lt.s32.totalorder %s3178_s16, %s4460_s0 }
  0x18   : > { %p2981_p2 = pnand %p2980_p1, %p2979_p0  ;;  %p2985_p5 = scmp.lt.s32.totalorder %s2983_s12, %s2978_s26 }
  0x1a   : > { %p2982_p3 = pneg %p2981_p2  ;;  %p2986_p7 = por %p2985_p5, %p2984_p4 }
  0x1c   : > { %p2987_p8 = pnand %p2986_p7, %p2982_p3 }
  0x1e   : > { %2990 = shalt.err (!%p2987_p8)
}
  0x1f   : > { %s2991_s11 = scalar_lea.vmem %s3186_s18, 512  ;;  %s3072_s14 = smov [#allocation2]  }
  0x20   : > { %p2992_p10 = scmp.ne.s32.totalorder %s3186_s18, %s2991_s11  ;;  %s2996_s15 = sshll.u32 %s3072_s14, 4  ;;  %s2997_s15 = int_to_ptr.vmem [resolvable:$false] %s2996_s15 }
  0x21   : > { %s2998_s17 = scalar_lea.vmem %s2997_s15, 1024  ;;  %p2999_p2 = scmp.lt.s32.totalorder %s3186_s18, %s2997_s15 }
  0x22   : > { %p2994_p9 = pnand %p2992_p10, %p2980_p1  ;;  %p3000_p12 = scmp.lt.s32.totalorder %s2998_s17, %s2991_s11 }
  0x24   : > { %p2995_p0 = pneg %p2994_p9  ;;  %p3001_p11 = por %p3000_p12, %p2999_p2 }
  0x26   : > { %p3002_p6 = pnand %p3001_p11, %p2995_p0 }
  0x28   : > { %3005 = shalt.err (!%p3002_p6)
}
  0x29   : > { %s3073_s26 = smov 64   ;;  %s3074_s28 = smov 4  }
  0x2a   : > { %2884 = dma.hbm_to_vmem [thread:$0]  (!%p3182_p13), %s3178_s16, 512, %s3186_s18, %s3188_s20, %s3073_s26, %s3073_s26, %s3074_s28  }
  0x2b   : > { %p2685_p9 = scmp.ge.s32.totalorder %s3070_s24, 1  ;;  %p231_p1 = scmp.lt.s32.totalorder %s3070_s24, 3 }
  0x2d   : > { %p232_p3 = pnand %p2685_p9, %p231_p1 }
  0x2f   : > { %235 = sbr.rel (%p232_p3) target bundleno = 1309 (0x51d), region = 44 }
  0x34   : > { %s3212_s29 = sand.u32 1, %s3062_s22   ;;  %p4493_p6 = scmp.ne.s32.totalorder %s4489_s8, 0 }
  0x35   : > { %s2686_s12 = sshll.u32 %s3212_s29, 5  ;;  %s238_s7 = scalar_lea.sflag [#allocation3], %s3212_s29 }
  0x36   : > { %s3218_s13 = scalar_lea.vmem [#allocation2], %s2686_s12 }
  0x37   : > { %3049 = dma.done.wait (%p4493_p6), %s238_s7, 512  }
  0x38   : > { %3051 = vsyncadd (%p4493_p6), %s238_s7, 4294966784  ;;  %vm336_vm0 = vcmask 1041409   ;;  %vm339_vm1 = vcmask 1042434   ;;  %vm342_vm2 = vcmask 1043459   ;;  %vm345_vm3 = vcmask 1044484   ;;  %s4317_s8 = scalar_lea.vmem [#allocation5], %s2686_s12 }
  0x39   : > { %vm348_vm4 = vcmask 1045509   ;;  %vm351_vm5 = vcmask 1046534   ;;  %vm354_vm6 = vcmask 1047559   ;;  %v3225_v0 = vld [vmem:[%s3218_s13] sm:$0x1]  ;;  %vm402_vm7 = vcmask 130048  }
  0x3a   : > { %v3228_v1 = vld [vmem:[%s3218_s13 + $0x4] sm:$0x1]  ;;  %v3231_v2 = vld [vmem:[%s3218_s13 + $0x8] sm:$0x1]  ;;  %v3234_v3 = vld [vmem:[%s3218_s13 + $0xc] sm:$0x1]  ;;  %v419_v6 = vmul.f32 %v3225_v0, %v3225_v0 }
  0x3b   : > { %v3237_v4 = vld [vmem:[%s3218_s13 + $0x10] sm:$0x1]  ;;  %v3240_v5 = vld [vmem:[%s3218_s13 + $0x14] sm:$0x1]  ;;  %v420_v7 = vmul.f32 %v3228_v1, %v3228_v1  ;;  %v421_v8 = vmul.f32 %v3231_v2, %v3231_v2  ;;  %v3249_v9 = vld [vmem:[%s3218_s13 + $0x18] sm:$0x1]  ;;  %v422_v13 = vmul.f32 %v3234_v3, %v3234_v3 }
  0x3c   : > { %v3252_v10 = vld [vmem:[%s3218_s13 + $0x1c] sm:$0x1]  ;;  %v335_v11 = vrot.slane %v3228_v1, 7  ;;  %v338_v12 = vrot.slane %v3231_v2, 6  ;;  %v423_v14 = vmul.f32 %v3237_v4, %v3237_v4  ;;  %v341_v15 = vrot.slane %v3234_v3, 5  ;;  %s2722_s12 = sshll.u32 %s3136_s25, 9 }
  0x3d   : > { %v344_v16 = vrot.slane %v3237_v4, 4  ;;  %v347_v17 = vrot.slane %v3240_v5, 3  ;;  %v350_v18 = vrot.slane %v3249_v9, 2  ;;  %v353_v20 = vrot.slane %v3252_v10, 1  ;;  %v3272_v23 = vld [vmem:[%s3218_s13 + $0x5] sm:$0x1]  ;;  %s4396_s19 = scalar_lea.hbm %s4466_s6, %s2722_s12 }
  0x3e   : > { %v337_v19 = vsel %vm336_vm0, %v335_v11, %v3225_v0  ;;  %v424_v21 = vmul.f32 %v3240_v5, %v3240_v5  ;;  %v425_v22 = vmul.f32 %v3249_v9, %v3249_v9  ;;  %v426_v25 = vmul.f32 %v3252_v10, %v3252_v10  ;;  %v3278_v28 = vld [vmem:[%s3218_s13 + $0x9] sm:$0x1]  ;;  %v3281_v29 = vld [vmem:[%s3218_s13 + $0xd] sm:$0x1]  ;;  %v3285_v34 = vld [vmem:[%s3218_s13 + $0x11] sm:$0x1] }
  0x3f   : > { %v340_v24 = vsel %vm339_vm1, %v338_v12, %v337_v19  ;;  %v483_v26 = vrot.slane %v420_v7, 7  ;;  %v485_v27 = vrot.slane %v421_v8, 6  ;;  %v487_v31 = vrot.slane %v422_v13, 5  ;;  %v3290_v39 = vld [vmem:[%s3218_s13 + $0x1] sm:$0x1]  ;;  %s2606_s16 = sshll.u32 %s4317_s8, 4  ;;  %s4398_s16 = int_to_ptr.vmem [resolvable:$true] %s2606_s16 }
  0x40   : > { %v343_v30 = vsel %vm342_vm2, %v341_v15, %v340_v24  ;;  %v489_v32 = vrot.slane %v423_v14, 4  ;;  %v491_v33 = vrot.slane %v424_v21, 3  ;;  %v493_v37 = vrot.slane %v425_v22, 2  ;;  %v3293_v40 = vld [vmem:[%s3218_s13 + $0x15] sm:$0x1]  ;;  %s2593_s20 = scalar_lea.sflag [#allocation4], %s3212_s29 }
  0x41   : > { %v346_v35 = vsel %vm345_vm3, %v344_v16, %v343_v30  ;;  %v484_v36 = vsel %vm336_vm0, %v483_v26, %v419_v6  ;;  %v495_v38 = vrot.slane %v426_v25, 1  ;;  %v3298_v43 = vld [vmem:[%s3218_s13 + $0x19] sm:$0x1]  ;;  %v356_v44 = vrot.slane %v3272_v23, 7  ;;  %v3305_v48 = vld [vmem:[%s3218_s13 + $0x1d] sm:$0x1] }
  0x42   : > { %v349_v41 = vsel %vm348_vm4, %v347_v17, %v346_v35  ;;  %v486_v42 = vsel %vm339_vm1, %v485_v27, %v484_v36  ;;  %v358_v45 = vrot.slane %v3278_v28, 6  ;;  %v360_v49 = vrot.slane %v3281_v29, 5  ;;  %v3330_v11 = vld [vmem:[%s3218_s13 + $0x6] sm:$0x1]  ;;  %v3333_v12 = vld [vmem:[%s3218_s13 + $0xa] sm:$0x1] }
  0x43   : > { %v352_v46 = vsel %vm351_vm5, %v350_v18, %v349_v41  ;;  %v488_v47 = vsel %vm342_vm2, %v487_v31, %v486_v42  ;;  %v362_v50 = vrot.slane %v3285_v34, 4  ;;  %v357_v53 = vsel %vm336_vm0, %v356_v44, %v3290_v39  ;;  %v3342_v17 = vld [vmem:[%s3218_s13 + $0xe] sm:$0x1]  ;;  %v3345_v18 = vld [vmem:[%s3218_s13 + $0x12] sm:$0x1]  ;;  %s3006_s11 = scalar_lea.vmem %s4398_s16, 512 }
  0x44   : > { %v355_v51 = vsel %vm354_vm6, %v353_v20, %v352_v46  ;;  %v490_v52 = vsel %vm345_vm3, %v489_v32, %v488_v47  ;;  %v364_v54 = vrot.slane %v3293_v40, 3  ;;  %v359_v57 = vsel %vm339_vm1, %v358_v45, %v357_v53  ;;  %v3355_v24 = vld [vmem:[%s3218_s13 + $0x2] sm:$0x1]  ;;  %v3358_v25 = vld [vmem:[%s3218_s13 + $0x16] sm:$0x1]  ;;  %p3007_p11 = scmp.ne.s32.totalorder %s4398_s16, %s3006_s11  ;;  %p4536_p12 = scmp.ne.s32.totalorder %s4490_s9, 0 }
  0x45   : > { %v403_v55 = vsel %vm402_vm7, %v355_v51, 0.0  ;;  %v492_v56 = vsel %vm348_vm4, %v491_v33, %v490_v52  ;;  %v366_v58 = vrot.slane %v3298_v43, 2  ;;  %v361_v60 = vsel %vm342_vm2, %v360_v49, %v359_v57  ;;  %v3361_v26 = vld [vmem:[%s3218_s13 + $0x1a] sm:$0x1]  ;;  %v3364_v27 = vld [vmem:[%s3218_s13 + $0x1e] sm:$0x1] }
  0x46   : > { %404 = vadd.xlane.f32.xlu0 %v403_v55  ;;  %v494_v59 = vsel %vm351_vm5, %v493_v37, %v492_v56  ;;  %v368_v61 = vrot.slane %v3305_v48, 1  ;;  %v427_v62 = vmul.f32 %v3290_v39, %v3290_v39  ;;  %v363_v6 = vsel %vm345_vm3, %v362_v50, %v361_v60  ;;  %v3368_v35 = vld [vmem:[%s3218_s13 + $0x7] sm:$0x1]  ;;  %v3372_v42 = vld [vmem:[%s3218_s13 + $0xb] sm:$0x1]  ;;  %p3008_p13 = pnand %p3007_p11, %p4536_p12  ;;  %s3077_s14 = smov [#allocation5]  }
  0x47   : > { %v496_v63 = vsel %vm354_vm6, %v495_v38, %v494_v59  ;;  %v428_v7 = vmul.f32 %v3272_v23, %v3272_v23  ;;  %v429_v8 = vmul.f32 %v3278_v28, %v3278_v28  ;;  %v365_v14 = vsel %vm348_vm4, %v364_v54, %v363_v6  ;;  %v3378_v49 = vld [vmem:[%s3218_s13 + $0xf] sm:$0x1]  ;;  %v3385_v54 = vld [vmem:[%s3218_s13 + $0x13] sm:$0x1]  ;;  %v3393_v59 = vld [vmem:[%s3218_s13 + $0x3] sm:$0x1] }
  0x48   : > { %v543_v13 = vsel %vm402_vm7, %v496_v63, 0.0  ;;  %v430_v15 = vmul.f32 %v3281_v29, %v3281_v29  ;;  %v431_v16 = vmul.f32 %v3285_v34, %v3285_v34  ;;  %v367_v19 = vsel %vm351_vm5, %v366_v58, %v365_v14  ;;  %v3396_v60 = vld [vmem:[%s3218_s13 + $0x17] sm:$0x1]  ;;  %v3401_v63 = vld [vmem:[%s3218_s13 + $0x1b] sm:$0x1]  ;;  %p3009_p4 = pneg %p3008_p13  ;;  %s3010_s15 = sshll.u32 %s3077_s14, 4  ;;  %s3011_s15 = int_to_ptr.vmem [resolvable:$false] %s3010_s15 }
  0x49   : > { %544 = vadd.xlane.f32.xlu1 %v543_v13  ;;  %v432_v20 = vmul.f32 %v3293_v40, %v3293_v40  ;;  %v433_v21 = vmul.f32 %v3298_v43, %v3298_v43  ;;  %v434_v22 = vmul.f32 %v3305_v48, %v3305_v48  ;;  %v369_v30 = vsel %vm354_vm6, %v368_v61, %v367_v19  ;;  %v3408_v14 = vld [vmem:[%s3218_s13 + $0x1f] sm:$0x1]  ;;  %s3012_s17 = scalar_lea.vmem %s3011_s15, 1024  ;;  %p3013_p5 = scmp.lt.s32.totalorder %s4398_s16, %s3011_s15 }
  0x4a   : > { %v497_v31 = vrot.slane %v428_v7, 7  ;;  %v499_v32 = vrot.slane %v429_v8, 6  ;;  %v501_v33 = vrot.slane %v430_v15, 5  ;;  %v406_v36 = vsel %vm402_vm7, %v369_v30, 0.0  ;;  %p3014_p7 = scmp.lt.s32.totalorder %s3012_s17, %s3006_s11 }
  0x4b   : > { %v503_v37 = vrot.slane %v431_v16, 4  ;;  %v505_v38 = vrot.slane %v432_v20, 3  ;;  %v507_v41 = vrot.slane %v433_v21, 2  ;;  %407 = vadd.xlane.f32.xlu0 %v406_v36  ;;  %v509_v45 = vrot.slane %v434_v22, 1 }
  0x4c   : > { %v498_v44 = vsel %vm336_vm0, %v497_v31, %v427_v62  ;;  %v370_v46 = vrot.slane %v3330_v11, 7  ;;  %v372_v47 = vrot.slane %v3333_v12, 6  ;;  %v374_v51 = vrot.slane %v3342_v17, 5  ;;  %p3015_p8 = por %p3014_p7, %p3013_p5 }
  0x4d   : > { %v500_v50 = vsel %vm339_vm1, %v499_v32, %v498_v44  ;;  %v376_v52 = vrot.slane %v3345_v18, 4  ;;  %v378_v53 = vrot.slane %v3358_v25, 3  ;;  %v380_v57 = vrot.slane %v3361_v26, 2 }
  0x4e   : > { %v502_v55 = vsel %vm342_vm2, %v501_v33, %v500_v50  ;;  %v371_v56 = vsel %vm336_vm0, %v370_v46, %v3355_v24  ;;  %v382_v58 = vrot.slane %v3364_v27, 1  ;;  %v384_v6 = vrot.slane %v3368_v35, 7  ;;  %p3016_p10 = pnand %p3015_p8, %p3009_p4 }
  0x4f   : > { %v504_v61 = vsel %vm345_vm3, %v503_v37, %v502_v55  ;;  %v373_v62 = vsel %vm339_vm1, %v372_v47, %v371_v56  ;;  %v386_v7 = vrot.slane %v3372_v42, 6  ;;  %v388_v15 = vrot.slane %v3378_v49, 5 }
  0x50   : > { %v506_v8 = vsel %vm348_vm4, %v505_v38, %v504_v61  ;;  %v375_v13 = vsel %vm342_vm2, %v374_v51, %v373_v62  ;;  %v390_v16 = vrot.slane %v3385_v54, 4  ;;  %v385_v21 = vsel %vm336_vm0, %v384_v6, %v3393_v59 }
  0x51   : > { %v508_v19 = vsel %vm351_vm5, %v507_v41, %v506_v8  ;;  %v377_v20 = vsel %vm345_vm3, %v376_v52, %v375_v13  ;;  %v392_v22 = vrot.slane %v3396_v60, 3  ;;  %v387_v32 = vsel %vm339_vm1, %v386_v7, %v385_v21 }
  0x52   : > { %v510_v30 = vsel %vm354_vm6, %v509_v45, %v508_v19  ;;  %v379_v31 = vsel %vm348_vm4, %v378_v53, %v377_v20  ;;  %v394_v33 = vrot.slane %v3401_v63, 2  ;;  %v389_v38 = vsel %vm342_vm2, %v388_v15, %v387_v32 }
  0x53   : > { %v546_v36 = vsel %vm402_vm7, %v510_v30, 0.0  ;;  %v381_v37 = vsel %vm351_vm5, %v380_v57, %v379_v31  ;;  %v396_v41 = vrot.slane %v3408_v14, 1  ;;  %v391_v46 = vsel %vm345_vm3, %v390_v16, %v389_v38 }
  0x54   : > { %547 = vadd.xlane.f32.xlu1 %v546_v36  ;;  %v383_v44 = vsel %vm354_vm6, %v382_v58, %v381_v37  ;;  %v435_v45 = vmul.f32 %v3355_v24, %v3355_v24  ;;  %v436_v47 = vmul.f32 %v3330_v11, %v3330_v11  ;;  %v393_v51 = vsel %vm348_vm4, %v392_v22, %v391_v46 }
  0x55   : > { %v409_v50 = vsel %vm402_vm7, %v383_v44, 0.0  ;;  %v437_v52 = vmul.f32 %v3333_v12, %v3333_v12  ;;  %v438_v53 = vmul.f32 %v3342_v17, %v3342_v17  ;;  %v395_v55 = vsel %vm351_vm5, %v394_v33, %v393_v51 }
  0x56   : > { %410 = vadd.xlane.f32.xlu0 %v409_v50  ;;  %v439_v56 = vmul.f32 %v3345_v18, %v3345_v18  ;;  %v440_v57 = vmul.f32 %v3358_v25, %v3358_v25  ;;  %v441_v58 = vmul.f32 %v3361_v26, %v3361_v26  ;;  %v397_v61 = vsel %vm354_vm6, %v396_v41, %v395_v55 }
  0x57   : > { %v442_v62 = vmul.f32 %v3364_v27, %v3364_v27  ;;  %v511_v6 = vrot.slane %v436_v47, 7  ;;  %v513_v7 = vrot.slane %v437_v52, 6  ;;  %v412_v8 = vsel %vm402_vm7, %v397_v61, 0.0 }
  0x58   : > { %v515_v13 = vrot.slane %v438_v53, 5  ;;  %v517_v15 = vrot.slane %v439_v56, 4  ;;  %v519_v16 = vrot.slane %v440_v57, 3  ;;  %413 = vadd.xlane.f32.xlu1 %v412_v8  ;;  %v521_v20 = vrot.slane %v441_v58, 2 }
  0x59   : > { %v512_v19 = vsel %vm336_vm0, %v511_v6, %v435_v45  ;;  %v523_v21 = vrot.slane %v442_v62, 1  ;;  %v443_v22 = vmul.f32 %v3393_v59, %v3393_v59  ;;  %v444_v31 = vmul.f32 %v3368_v35, %v3368_v35 }
  0x5a   : > { %v514_v30 = vsel %vm339_vm1, %v513_v7, %v512_v19  ;;  %v445_v32 = vmul.f32 %v3372_v42, %v3372_v42  ;;  %v446_v33 = vmul.f32 %v3378_v49, %v3378_v49  ;;  %v447_v37 = vmul.f32 %v3385_v54, %v3385_v54 }
  0x5b   : > { %v516_v36 = vsel %vm342_vm2, %v515_v13, %v514_v30  ;;  %v448_v38 = vmul.f32 %v3396_v60, %v3396_v60  ;;  %v449_v41 = vmul.f32 %v3401_v63, %v3401_v63  ;;  %v450_v46 = vmul.f32 %v3408_v14, %v3408_v14 }
  0x5c   : > { %v518_v44 = vsel %vm345_vm3, %v517_v15, %v516_v36  ;;  %v525_v45 = vrot.slane %v444_v31, 7  ;;  %v527_v47 = vrot.slane %v445_v32, 6  ;;  %v529_v51 = vrot.slane %v446_v33, 5  ;;  %v3495_v31 = vld [vmem:[%s4461_s1] sm:$0xff] }
  0x5d   : > { %v520_v50 = vsel %vm348_vm4, %v519_v16, %v518_v44  ;;  %v531_v52 = vrot.slane %v447_v37, 4  ;;  %v533_v56 = vrot.slane %v448_v38, 3  ;;  %v535_v61 = vrot.slane %v449_v41, 2  ;;  %4494 = vst [vmem:[#allocation8_spill] sm:$0xff] %v3495_v31 }
  0x5e   : > { %v522_v53 = vsel %vm351_vm5, %v521_v20, %v520_v50  ;;  %v526_v55 = vsel %vm336_vm0, %v525_v45, %v443_v22  ;;  %v537_v7 = vrot.slane %v450_v46, 1  ;;  %v3483_v20 = vld [vmem:[%s4462_s2] sm:$0xff]  ;;  %vm850_vm8 = vcmask 64512  }
  0x5f   : > { %v524_v57 = vsel %vm354_vm6, %v523_v21, %v522_v53  ;;  %v528_v58 = vsel %vm339_vm1, %v527_v47, %v526_v55  ;;  %2779 = vmatprep.mubr.msk.f32.mxu0 %vm850_vm8, %v3483_v20  ;;  %2787 = vmatprep.mubr.msk.f32.mxu1 %vm850_vm8, %v3483_v20  ;;  %v767_v21 = vlaneseq  ;;  %vm3076_vm9 = vmmov 0  }
  0x60   : > { %v549_v62 = vsel %vm402_vm7, %v524_v57, 0.0  ;;  %v530_v6 = vsel %vm342_vm2, %v529_v51, %v528_v58  ;;  %vm1295_vm10 = vcmask 261120   ;;  %vm2559_vm11 = vcmask 122880  }
  0x61   : > { %550 = vadd.xlane.f32.xlu0 %v549_v62  ;;  %v532_v8 = vsel %vm345_vm3, %v531_v52, %v530_v6  ;;  %v3489_v22 = vshrl.u32 %v767_v21, 7 }
  0x62   : > { %v534_v13 = vsel %vm348_vm4, %v533_v56, %v532_v8 }
  0x63   : > { %v536_v15 = vsel %vm351_vm5, %v535_v61, %v534_v13  ;;  %v810_v30 = vsub.s32 1, %v3489_v22  ;;  %v769_v45 = vsub.s32 0, %v3489_v22 }
  0x64   : > { %v538_v16 = vsel %vm354_vm6, %v537_v7, %v536_v15 }
  0x65   : > { %v552_v19 = vsel %vm402_vm7, %v538_v16, 0.0  ;;  %v811_v32 = vrot.slane %v3495_v31, %v810_v30  ;;  %v3510_v56 = vrot.slane %v3495_v31, %v769_v45 }
  0x66   : > { %553 = vadd.xlane.f32.xlu1 %v552_v19 }
  0x77   : > { %821 = vbcast.lane.b32.xlu1 %v811_v32, 272  ;;  %825 = vbcast.lane.b32.xlu0 %v811_v32, 280 }
  0x7b   : > { %817 = vbcast.lane.b32.xlu1 %v811_v32, 264 }
  0x7f   : > { %813 = vbcast.lane.b32.xlu1 %v811_v32, 256 }
  0xcf   : > { %v405_v33 = vpop.xlane.xlu0 %404 }
  0xd0   : > { %v3498_v36 = vmul.f32 0.0625, %v405_v33 }
  0xd2   : > { %v545_v37 = vpop.xlane.xlu1 %544  ;;  %v559_v38 = vmul.f32 %v3498_v36, %v3498_v36  ;;  %v571_v51 = vrot.slane %v3498_v36, 1  ;;  %v572_v52 = vrot.slane %v3498_v36, 2  ;;  %v573_v53 = vrot.slane %v3498_v36, 3 }
  0xd3   : > { %v555_v41 = vmul.f32 0.0625, %v545_v37  ;;  %v574_v55 = vrot.slane %v3498_v36, 4  ;;  %v575_v57 = vrot.slane %v3498_v36, 5  ;;  %v576_v58 = vrot.slane %v3498_v36, 6 }
  0xd4   : > { %v408_v46 = vpop.xlane.xlu0 %407  ;;  %v577_v61 = vrot.slane %v3498_v36, 7  ;;  %v631_v62 = vsub.f32 %v3225_v0, %v3498_v36  ;;  %v632_v7 = vsub.f32 %v3228_v1, %v571_v51  ;;  %v633_v8 = vsub.f32 %v3231_v2, %v572_v52 }
  0xd5   : > { %v563_v44 = vsub.f32 %v555_v41, %v559_v38  ;;  %v3503_v50 = vmul.f32 0.0625, %v408_v46  ;;  %v634_v0 = vsub.f32 %v3234_v3, %v573_v53  ;;  %v635_v33 = vsub.f32 %v3237_v4, %v574_v55 }
  0xd6   : > { %v636_v2 = vsub.f32 %v3240_v5, %v575_v57  ;;  %v637_v37 = vsub.f32 %v3249_v9, %v576_v58  ;;  %v638_v38 = vsub.f32 %v3252_v10, %v577_v61 }
  0xd7   : > { %v663_v47 = vadd.f32 1.013279e-06, %v563_v44  ;;  %v560_v6 = vmul.f32 %v3503_v50, %v3503_v50  ;;  %v578_v13 = vrot.slane %v3503_v50, 1  ;;  %v579_v16 = vrot.slane %v3503_v50, 2 }
  0xd8   : > { %v580_v19 = vrot.slane %v3503_v50, 3  ;;  %v581_v21 = vrot.slane %v3503_v50, 4  ;;  %v582_v30 = vrot.slane %v3503_v50, 5  ;;  %v583_v1 = vrot.slane %v3503_v50, 6 }
  0xd9   : > { %2929 = vrsqrt.f32 %v663_v47  ;;  %v584_v41 = vrot.slane %v3503_v50, 7  ;;  %v3538_v3 = vsub.f32 %v3272_v23, %v578_v13  ;;  %v3541_v4 = vsub.f32 %v3278_v28, %v579_v16 }
  0xda   : > { %v3544_v5 = vsub.f32 %v3281_v29, %v580_v19  ;;  %v3547_v9 = vsub.f32 %v3285_v34, %v581_v21  ;;  %v3550_v10 = vsub.f32 %v3293_v40, %v582_v30  ;;  %v3553_v52 = vsub.f32 %v3298_v43, %v583_v1 }
  0xdb   : > { %v3565_v57 = vsub.f32 %v3305_v48, %v584_v41 }
  0xdd   : > { %v548_v15 = vpop.xlane.xlu1 %547 }
  0xde   : > { %v556_v32 = vmul.f32 0.0625, %v548_v15 }
  0xdf   : > { %v411_v36 = vpop.xlane.xlu0 %410 }
  0xe0   : > { %v564_v44 = vsub.f32 %v556_v32, %v560_v6  ;;  %v3533_v46 = vmul.f32 0.0625, %v411_v36 }
  0xe1   : > { %v414_v51 = vpop.xlane.xlu1 %413 }
  0xe2   : > { %v664_v47 = vadd.f32 1.013279e-06, %v564_v44  ;;  %v585_v23 = vrot.slane %v3533_v46, 1  ;;  %v586_v53 = vrot.slane %v3533_v46, 2  ;;  %v3557_v28 = vmul.f32 0.0625, %v414_v51 }
  0xe3   : > { %v587_v29 = vrot.slane %v3533_v46, 3  ;;  %v588_v55 = vrot.slane %v3533_v46, 4  ;;  %v589_v34 = vrot.slane %v3533_v46, 5  ;;  %v561_v40 = vmul.f32 %v3533_v46, %v3533_v46 }
  0xe4   : > { %2931 = vrsqrt.f32 %v664_v47  ;;  %v590_v43 = vrot.slane %v3533_v46, 6  ;;  %v3570_v58 = vmul.f32 %v3557_v28, %v3557_v28  ;;  %v591_v61 = vrot.slane %v3533_v46, 7 }
  0xe5   : > { %v3576_v13 = vsub.f32 %v3330_v11, %v585_v23  ;;  %v3579_v16 = vsub.f32 %v3333_v12, %v586_v53  ;;  %v3582_v48 = vsub.f32 %v3342_v17, %v587_v29  ;;  %v3585_v19 = vsub.f32 %v3345_v18, %v588_v55 }
  0xe6   : > { %v2930_v15 = vpop.eup %2929  ;;  %v3588_v21 = vsub.f32 %v3358_v25, %v589_v34  ;;  %v3591_v55 = vsub.f32 %v3361_v26, %v590_v43 }
  0xe7   : > { %v675_v30 = vrot.slane %v2930_v15, 1  ;;  %v676_v32 = vrot.slane %v2930_v15, 2  ;;  %v677_v1 = vrot.slane %v2930_v15, 3  ;;  %v678_v36 = vrot.slane %v2930_v15, 4 }
  0xe8   : > { %v679_v41 = vrot.slane %v2930_v15, 5  ;;  %v680_v11 = vrot.slane %v2930_v15, 6  ;;  %v681_v44 = vrot.slane %v2930_v15, 7  ;;  %v735_v47 = vmul.f32 %v2930_v15, %v631_v62 }
  0xe9   : > { %v736_v51 = vmul.f32 %v675_v30, %v632_v7  ;;  %v737_v12 = vmul.f32 %v676_v32, %v633_v8  ;;  %v738_v23 = vmul.f32 %v677_v1, %v634_v0  ;;  %v739_v53 = vmul.f32 %v678_v36, %v635_v33 }
  0xea   : > { %v551_v17 = vpop.xlane.xlu0 %550  ;;  %v740_v29 = vmul.f32 %v679_v41, %v636_v2  ;;  %v741_v6 = vmul.f32 %v680_v11, %v637_v37  ;;  %v742_v18 = vmul.f32 %v681_v44, %v638_v38  ;;  %v771_v2 = vmul.f32 %v3510_v56, %v735_v47 }
  0xeb   : > { %v557_v25 = vmul.f32 0.0625, %v551_v17  ;;  %v772_v34 = vmul.f32 %v3510_v56, %v736_v51  ;;  %v773_v45 = vmul.f32 %v3510_v56, %v737_v12  ;;  %v774_v31 = vmul.f32 %v3510_v56, %v738_v23 }
  0xec   : > { %v775_v62 = vmul.f32 %v3510_v56, %v739_v53  ;;  %v776_v7 = vmul.f32 %v3510_v56, %v740_v29  ;;  %v777_v8 = vmul.f32 %v3510_v56, %v741_v6  ;;  %v778_v0 = vmul.f32 %v3510_v56, %v742_v18 }
  0xed   : > { %v565_v33 = vsub.f32 %v557_v25, %v561_v40  ;;  %v835_v26 = vrot.slane %v772_v34, 7  ;;  %v837_v37 = vrot.slane %v773_v45, 6  ;;  %v839_v38 = vrot.slane %v774_v31, 5 }
  0xee   : > { %v841_v43 = vrot.slane %v775_v62, 4  ;;  %v843_v15 = vrot.slane %v776_v7, 3  ;;  %v3602_v30 = vsub.f32 %v3364_v27, %v591_v61  ;;  %v845_v41 = vrot.slane %v777_v8, 2 }
  0xef   : > { %v665_v32 = vadd.f32 1.013279e-06, %v565_v33  ;;  %v554_v1 = vpop.xlane.xlu1 %553  ;;  %v836_v36 = vsel %vm336_vm0, %v835_v26, %v771_v2  ;;  %v847_v11 = vrot.slane %v778_v0, 1  ;;  %v592_v40 = vrot.slane %v3557_v28, 1 }
  0xf0   : > { %v558_v6 = vmul.f32 0.0625, %v554_v1  ;;  %v838_v44 = vsel %vm339_vm1, %v837_v37, %v836_v36  ;;  %v593_v47 = vrot.slane %v3557_v28, 2  ;;  %v594_v27 = vrot.slane %v3557_v28, 3 }
  0xf1   : > { %v2932_v45 = vpop.eup %2931  ;;  %2933 = vrsqrt.f32 %v665_v32  ;;  %v840_v31 = vsel %vm342_vm2, %v839_v38, %v838_v44  ;;  %v595_v61 = vrot.slane %v3557_v28, 4  ;;  %v4495_v33 = vsub.f32 %v3290_v39, %v3503_v50  ;;  %v3632_v32 = vld [vmem:[%s4462_s2 + $0x10] sm:$0xff] }
  0xf2   : > { %v566_v51 = vsub.f32 %v558_v6, %v3570_v58  ;;  %v842_v12 = vsel %vm345_vm3, %v841_v43, %v840_v31  ;;  %v682_v23 = vrot.slane %v2932_v45, 1  ;;  %v683_v53 = vrot.slane %v2932_v45, 2  ;;  %v3619_v58 = vld [vmem:[%s4462_s2 + $0x8] sm:$0xff] }
  0xf3   : > { %v844_v17 = vsel %vm348_vm4, %v843_v15, %v842_v12  ;;  %v684_v29 = vrot.slane %v2932_v45, 3  ;;  %v685_v18 = vrot.slane %v2932_v45, 4  ;;  %v686_v25 = vrot.slane %v2932_v45, 5 }
  0xf4   : > { %v666_v34 = vadd.f32 1.013279e-06, %v566_v51  ;;  %v846_v62 = vsel %vm351_vm5, %v845_v41, %v844_v17  ;;  %v687_v7 = vrot.slane %v2932_v45, 6  ;;  %v688_v8 = vrot.slane %v2932_v45, 7 }
  0xf5   : > { %v848_v0 = vsel %vm354_vm6, %v847_v11, %v846_v62  ;;  %v743_v2 = vmul.f32 %v2932_v45, %v4495_v33  ;;  %v744_v26 = vmul.f32 %v682_v23, %v3538_v3  ;;  %v745_v37 = vmul.f32 %v683_v53, %v3541_v4  ;;  %v3652_v11 = vld [vmem:[%s4462_s2 + $0x18] sm:$0xff] }
  0xf6   : > { %2935 = vrsqrt.f32 %v666_v34  ;;  %2777 = vmatprep.subr.mxu0 %v848_v0  ;;  %v746_v38 = vmul.f32 %v684_v29, %v3544_v5  ;;  %v747_v43 = vmul.f32 %v685_v18, %v3547_v9  ;;  %v748_v15 = vmul.f32 %v686_v25, %v3550_v10 }
  0xf7   : > { %2778 = vmatpush3.msra.mxu0 %v848_v0  ;;  %v749_v39 = vmul.f32 %v687_v7, %v3553_v52  ;;  %v750_v50 = vmul.f32 %v688_v8, %v3565_v57  ;;  %v780_v3 = vmul.f32 %v3510_v56, %v744_v26  ;;  %v596_v4 = vrot.slane %v3557_v28, 5 }
  0xf8   : > { %2780 = vmatmul.mubr.msk.f32.vlgmr.msra.gmra.mxu0 %vm850_vm8, %v3619_v58  ;;  %v781_v5 = vmul.f32 %v3510_v56, %v745_v37  ;;  %v782_v9 = vmul.f32 %v3510_v56, %v746_v38  ;;  %v783_v10 = vmul.f32 %v3510_v56, %v747_v43  ;;  %v784_v1 = vmul.f32 %v3510_v56, %v748_v15 }
  0xf9   : > { %v779_v36 = vmul.f32 %v3510_v56, %v743_v2  ;;  %v785_v52 = vmul.f32 %v3510_v56, %v749_v39  ;;  %v786_v57 = vmul.f32 %v3510_v56, %v750_v50  ;;  %v956_v41 = vrot.slane %v780_v3, 7  ;;  %2782 = vmatprep.mubr.msk.f32.mxu0 %vm850_vm8, %v3632_v32 }
  0xfa   : > { %v958_v6 = vrot.slane %v781_v5, 6  ;;  %v960_v44 = vrot.slane %v782_v9, 5  ;;  %v597_v45 = vrot.slane %v3557_v28, 6  ;;  %v598_v31 = vrot.slane %v3557_v28, 7 }
  0xfb   : > { %v957_v51 = vsel %vm336_vm0, %v956_v41, %v779_v36  ;;  %v962_v12 = vrot.slane %v783_v10, 4  ;;  %v964_v23 = vrot.slane %v784_v1, 3  ;;  %v966_v53 = vrot.slane %v785_v52, 2 }
  0xfc   : > { %v959_v17 = vsel %vm339_vm1, %v958_v6, %v957_v51  ;;  %v968_v29 = vrot.slane %v786_v57, 1  ;;  %2783 = vmatmul.mubr.msk.f32.gmra.mxu0 %vm850_vm8, %v3652_v11  ;;  %v655_v18 = vsub.f32 %v3393_v59, %v3557_v28  ;;  %v3663_v25 = vsub.f32 %v3368_v35, %v592_v40 }
  0xfd   : > { %v961_v34 = vsel %vm342_vm2, %v960_v44, %v959_v17  ;;  %2795 = vmatprep.mubr.msk.f32.mxu0 %vm850_vm8, %v3483_v20  ;;  %v657_v62 = vsub.f32 %v3372_v42, %v593_v47  ;;  %v658_v7 = vsub.f32 %v3378_v49, %v594_v27  ;;  %v3671_v8 = vsub.f32 %v3385_v54, %v595_v61 }
  0xfe   : > { %v2934_v0 = vpop.eup %2933  ;;  %v963_v33 = vsel %vm345_vm3, %v962_v12, %v961_v34  ;;  %v660_v59 = vsub.f32 %v3396_v60, %v596_v4  ;;  %v661_v35 = vsub.f32 %v3401_v63, %v597_v45  ;;  %v662_v28 = vsub.f32 %v3408_v14, %v598_v31 }
  0xff   : > { %v965_v40 = vsel %vm348_vm4, %v964_v23, %v963_v33  ;;  %v689_v2 = vrot.slane %v2934_v0, 1  ;;  %v690_v26 = vrot.slane %v2934_v0, 2  ;;  %v691_v37 = vrot.slane %v2934_v0, 3 }
 0x100   : > { %v967_v42 = vsel %vm351_vm5, %v966_v53, %v965_v40  ;;  %v692_v49 = vrot.slane %v2934_v0, 4  ;;  %v693_v47 = vrot.slane %v2934_v0, 5  ;;  %v694_v54 = vrot.slane %v2934_v0, 6 }
 0x101   : > { %v969_v27 = vsel %vm354_vm6, %v968_v29, %v967_v42  ;;  %v695_v61 = vrot.slane %v2934_v0, 7  ;;  %v4496_v60 = vsub.f32 %v3355_v24, %v3533_v46  ;;  %v752_v63 = vmul.f32 %v689_v2, %v3576_v13 }
 0x102   : > { %2785 = vmatprep.subr.mxu1 %v969_v27  ;;  %v753_v14 = vmul.f32 %v690_v26, %v3579_v16  ;;  %v754_v43 = vmul.f32 %v691_v37, %v3582_v48  ;;  %v755_v15 = vmul.f32 %v692_v49, %v3585_v19  ;;  %v756_v39 = vmul.f32 %v693_v47, %v3588_v21 }
 0x103   : > { %v751_v38 = vmul.f32 %v2934_v0, %v4496_v60  ;;  %v2936_v50 = vpop.eup %2935  ;;  %2786 = vmatpush3.msra.mxu1 %v969_v27  ;;  %v757_v3 = vmul.f32 %v694_v54, %v3591_v55  ;;  %v758_v4 = vmul.f32 %v695_v61, %v3602_v30  ;;  %v788_v46 = vmul.f32 %v3510_v56, %v752_v63 }
 0x104   : > { %2788 = vmatmul.mubr.msk.f32.vlgmr.msra.gmra.mxu1 %vm850_vm8, %v3619_v58  ;;  %v789_v13 = vmul.f32 %v3510_v56, %v753_v14  ;;  %v790_v16 = vmul.f32 %v3510_v56, %v754_v43  ;;  %v791_v48 = vmul.f32 %v3510_v56, %v755_v15  ;;  %v792_v19 = vmul.f32 %v3510_v56, %v756_v39 }
 0x105   : > { %v787_v24 = vmul.f32 %v3510_v56, %v751_v38  ;;  %2790 = vmatprep.mubr.msk.f32.mxu1 %vm850_vm8, %v3632_v32  ;;  %v793_v21 = vmul.f32 %v3510_v56, %v757_v3  ;;  %v794_v55 = vmul.f32 %v3510_v56, %v758_v4  ;;  %v1064_v30 = vrot.slane %v788_v46, 7 }
 0x106   : > { %v696_v5 = vrot.slane %v2936_v50, 1  ;;  %v1066_v9 = vrot.slane %v789_v13, 6  ;;  %v1068_v10 = vrot.slane %v790_v16, 5  ;;  %v1070_v1 = vrot.slane %v791_v48, 4  ;;  %v3754_v48 = vpop.permute.xlu0 %825 }
 0x107   : > { %v1072_v36 = vrot.slane %v792_v19, 3  ;;  %v1065_v52 = vsel %vm336_vm0, %v1064_v30, %v787_v24  ;;  %v1074_v57 = vrot.slane %v793_v21, 2  ;;  %v1076_v41 = vrot.slane %v794_v55, 1  ;;  %v4497_v24 = vld [vmem:[#allocation8_spill] sm:$0xff] }
 0x108   : > { %v697_v6 = vrot.slane %v2936_v50, 2  ;;  %2791 = vmatmul.mubr.msk.f32.gmra.mxu1 %vm850_vm8, %v3652_v11  ;;  %v1067_v44 = vsel %vm339_vm1, %v1066_v9, %v1065_v52  ;;  %v698_v45 = vrot.slane %v2936_v50, 3  ;;  %v699_v31 = vrot.slane %v2936_v50, 4 }
 0x109   : > { %v700_v51 = vrot.slane %v2936_v50, 5  ;;  %v1069_v12 = vsel %vm342_vm2, %v1068_v10, %v1067_v44  ;;  %v701_v23 = vrot.slane %v2936_v50, 6  ;;  %v702_v53 = vrot.slane %v2936_v50, 7  ;;  %2803 = vmatprep.mubr.msk.f32.mxu1 %vm850_vm8, %v3483_v20 }
 0x10a   : > { %v759_v17 = vmul.f32 %v2936_v50, %v655_v18  ;;  %v1071_v29 = vsel %vm345_vm3, %v1070_v1, %v1069_v12  ;;  %v760_v34 = vmul.f32 %v696_v5, %v3663_v25  ;;  %v761_v0 = vmul.f32 %v697_v6, %v657_v62  ;;  %v3767_v6 = vld [vmem:[%s4463_s3] sm:$0xff] }
 0x10b   : > { %v762_v33 = vmul.f32 %v698_v45, %v658_v7  ;;  %v1073_v40 = vsel %vm348_vm4, %v1072_v36, %v1071_v29  ;;  %v763_v2 = vmul.f32 %v699_v31, %v3671_v8  ;;  %v764_v26 = vmul.f32 %v700_v51, %v660_v59 }
 0x10c   : > { %v765_v37 = vmul.f32 %v701_v23, %v661_v35  ;;  %v1075_v42 = vsel %vm351_vm5, %v1074_v57, %v1073_v40  ;;  %v766_v49 = vmul.f32 %v702_v53, %v662_v28  ;;  %v796_v18 = vmul.f32 %v3510_v56, %v760_v34 }
 0x10d   : > { %v1077_v47 = vsel %vm354_vm6, %v1076_v41, %v1075_v42  ;;  %v797_v20 = vmul.f32 %v3510_v56, %v761_v0  ;;  %v798_v54 = vmul.f32 %v3510_v56, %v762_v33  ;;  %v799_v25 = vmul.f32 %v3510_v56, %v763_v2 }
 0x10e   : > { %2793 = vmatprep.subr.mxu0 %v1077_v47  ;;  %v795_v62 = vmul.f32 %v3510_v56, %v759_v17  ;;  %v800_v7 = vmul.f32 %v3510_v56, %v764_v26  ;;  %v1172_v8 = vrot.slane %v796_v18, 7  ;;  %v801_v59 = vmul.f32 %v3510_v56, %v765_v37 }
 0x10f   : > { %2794 = vmatpush3.msra.mxu0 %v1077_v47  ;;  %v1174_v35 = vrot.slane %v797_v20, 6  ;;  %v802_v28 = vmul.f32 %v3510_v56, %v766_v49  ;;  %v1176_v61 = vrot.slane %v798_v54, 5  ;;  %v1178_v38 = vrot.slane %v799_v25, 4 }
 0x110   : > { %2796 = vmatmul.mubr.msk.f32.vlgmr.msra.gmra.mxu0 %vm850_vm8, %v3619_v58  ;;  %v1173_v27 = vsel %vm336_vm0, %v1172_v8, %v795_v62  ;;  %v1180_v14 = vrot.slane %v800_v7, 3  ;;  %v1182_v15 = vrot.slane %v801_v59, 2  ;;  %v3075_v4 = vmov 0.0  }
 0x111   : > { %v1175_v60 = vsel %vm339_vm1, %v1174_v35, %v1173_v27  ;;  %2798 = vmatprep.mubr.msk.f32.mxu0 %vm850_vm8, %v3632_v32  ;;  %v1184_v50 = vrot.slane %v802_v28, 1  ;;  %2809 = vmatprep.subr.mxu0 %v3075_v4 }
 0x112   : > { %v1177_v63 = vsel %vm342_vm2, %v1176_v61, %v1175_v60 }
 0x113   : > { %v1179_v43 = vsel %vm345_vm3, %v1178_v38, %v1177_v63 }
 0x114   : > { %v1181_v39 = vsel %vm348_vm4, %v1180_v14, %v1179_v43  ;;  %2799 = vmatmul.mubr.msk.f32.gmra.mxu0 %vm850_vm8, %v3652_v11 }
 0x115   : > { %v1183_v56 = vsel %vm351_vm5, %v1182_v15, %v1181_v39  ;;  %2817 = vmatprep.mubr.msk.f32.mxu0 %vm3076_vm9, %v3075_v4 }
 0x116   : > { %v1185_v3 = vsel %vm354_vm6, %v1184_v50, %v1183_v56 }
 0x117   : > { %2801 = vmatprep.subr.mxu1 %v1185_v3 }
 0x118   : > { %2802 = vmatpush3.msra.mxu1 %v1185_v3 }
 0x119   : > { %2804 = vmatmul.mubr.msk.f32.vlgmr.msra.gmra.mxu1 %vm850_vm8, %v3619_v58  ;;  %2820 = vmatprep.subr.mxu1 %v3075_v4  ;;  %v1290_v58 = vsub.s32 2, %v3489_v22 }
 0x11a   : > { %2806 = vmatprep.mubr.msk.f32.mxu1 %vm850_vm8, %v3632_v32  ;;  %v3750_v32 = vpop.permute.xlu1 %821 }
 0x11b   : > { %v1291_v46 = vrot.slane %v4497_v24, %v1290_v58 }
 0x11d   : > { %2807 = vmatmul.mubr.msk.f32.gmra.mxu1 %vm850_vm8, %v3652_v11  ;;  %1293 = vbcast.lane.b32.xlu0 %v1291_v46, 256 }
 0x11e   : > { %2828 = vmatprep.mubr.msk.f32.mxu1 %vm3076_vm9, %v3075_v4  ;;  %v3752_v13 = vpop.permute.xlu1 %817 }
 0x122   : > { %v3757_v55 = vpop.permute.xlu1 %813 }
 0x18f   : > { %v3805_v43 = vpop.permute.xlu0 %1293 }
 0x1b8   : > { %v2781_v11 = vpop.f32.mrf.mxu0 }
 0x1b9   : > { %v935_v5 = vadd.f32 %v2781_v11, %v3752_v13  ;;  %v2945_v11 = vld [vmem:[%s3218_s13] sm:$0x1] }
 0x1ba   : > { %v929_v16 = vpop.f32.mrf.mxu0 }
 0x1bb   : > { %v930_v1 = vadd.f32 %v929_v16, %v3757_v55  ;;  %v1273_v52 = vmax.f32 %v935_v5, 0.0  ;;  %v2946_v16 = vld [vmem:[%s3218_s13 + $0x4] sm:$0x1]  ;;  %v2949_v5 = vld [vmem:[%s3218_s13 + $0x10] sm:$0x1] }
 0x1bc   : > { %v2784_v19 = vpop.f32.mrf.mxu0 }
 0x1bd   : > { %v945_v21 = vadd.f32 %v2784_v19, %v3754_v48  ;;  %v1272_v41 = vmax.f32 %v930_v1, 0.0  ;;  %v2947_v19 = vld [vmem:[%s3218_s13 + $0x8] sm:$0x1] }
 0x1be   : > { %v939_v30 = vpop.f32.mrf.mxu0 }
 0x1bf   : > { %v1275_v9 = vmax.f32 %v945_v21, 0.0  ;;  %v940_v10 = vadd.f32 %v939_v30, %v3750_v32 }
 0x1c1   : > { %v1274_v36 = vmax.f32 %v940_v10, 0.0  ;;  %2810 = vmatpush3.msra.mxu0 %v1275_v9  ;;  %v2950_v10 = vld [vmem:[%s3218_s13 + $0x14] sm:$0x1] }
 0x1c2   : > { %2811 = vmatprep.subr.mxu0 %v3075_v4 }
 0x1c3   : > { %2812 = vmatpush3.msra.mxu0 %v1274_v36  ;;  %v2951_v36 = vld [vmem:[%s3218_s13 + $0x18] sm:$0x1] }
 0x1c4   : > { %v2789_v57 = vpop.f32.mrf.mxu1  ;;  %2813 = vmatprep.subr.mxu0 %v3075_v4 }
 0x1c5   : > { %2814 = vmatpush3.msra.mxu0 %v1273_v52  ;;  %v1043_v12 = vadd.f32 %v2789_v57, %v3752_v13  ;;  %v2952_v57 = vld [vmem:[%s3218_s13 + $0x1c] sm:$0x1] }
 0x1c6   : > { %v1037_v44 = vpop.f32.mrf.mxu1  ;;  %2815 = vmatprep.subr.mxu0 %v3075_v4 }
 0x1c7   : > { %2816 = vmatpush3.msra.mxu0 %v1272_v41  ;;  %v1038_v17 = vadd.f32 %v1037_v44, %v3757_v55  ;;  %v1277_v34 = vmax.f32 %v1043_v12, 0.0 }
 0x1c8   : > { %v2792_v45 = vpop.f32.mrf.mxu1  ;;  %2818 = vmatmul.mubr.msk.f32.vlgmr.msra.gmra.mxu0 %vm1295_vm10, %v3767_v6  ;;  %2831 = vmatprep.subr.mxu0 %v3075_v4 }
 0x1c9   : > { %v1053_v31 = vadd.f32 %v2792_v45, %v3754_v48  ;;  %2839 = vmatprep.mubr.msk.f32.mxu0 %vm3076_vm9, %v3075_v4  ;;  %v1276_v33 = vmax.f32 %v1038_v17, 0.0 }
 0x1ca   : > { %v1047_v51 = vpop.f32.mrf.mxu1 }
 0x1cb   : > { %v1279_v23 = vmax.f32 %v1053_v31, 0.0  ;;  %v1048_v53 = vadd.f32 %v1047_v51, %v3750_v32 }
 0x1cd   : > { %v1278_v29 = vmax.f32 %v1048_v53, 0.0  ;;  %2821 = vmatpush3.msra.mxu1 %v1279_v23 }
 0x1ce   : > { %2822 = vmatprep.subr.mxu1 %v3075_v4 }
 0x1cf   : > { %2823 = vmatpush3.msra.mxu1 %v1278_v29 }
 0x1d0   : > { %v2797_v0 = vpop.f32.mrf.mxu0  ;;  %2824 = vmatprep.subr.mxu1 %v3075_v4 }
 0x1d1   : > { %2825 = vmatpush3.msra.mxu1 %v1277_v34  ;;  %v1151_v42 = vadd.f32 %v2797_v0, %v3752_v13 }
 0x1d2   : > { %v1145_v40 = vpop.f32.mrf.mxu0  ;;  %2826 = vmatprep.subr.mxu1 %v3075_v4 }
 0x1d3   : > { %2827 = vmatpush3.msra.mxu1 %v1276_v33  ;;  %v1146_v47 = vadd.f32 %v1145_v40, %v3757_v55  ;;  %v1281_v25 = vmax.f32 %v1151_v42, 0.0 }
 0x1d4   : > { %v2800_v2 = vpop.f32.mrf.mxu0  ;;  %2829 = vmatmul.mubr.msk.f32.vlgmr.msra.gmra.mxu1 %vm1295_vm10, %v3767_v6  ;;  %2842 = vmatprep.subr.mxu1 %v3075_v4 }
 0x1d5   : > { %v1161_v26 = vadd.f32 %v2800_v2, %v3754_v48  ;;  %2850 = vmatprep.mubr.msk.f32.mxu1 %vm3076_vm9, %v3075_v4  ;;  %v1280_v7 = vmax.f32 %v1146_v47, 0.0 }
 0x1d6   : > { %v1155_v37 = vpop.f32.mrf.mxu0 }
 0x1d7   : > { %v1283_v49 = vmax.f32 %v1161_v26, 0.0  ;;  %v1156_v18 = vadd.f32 %v1155_v37, %v3750_v32 }
 0x1d9   : > { %v2805_v20 = vpop.f32.mrf.mxu1  ;;  %v1282_v54 = vmax.f32 %v1156_v18, 0.0  ;;  %2832 = vmatpush3.msra.mxu0 %v1283_v49 }
 0x1da   : > { %2833 = vmatprep.subr.mxu0 %v3075_v4  ;;  %v1259_v28 = vadd.f32 %v2805_v20, %v3752_v13 }
 0x1db   : > { %v1253_v62 = vpop.f32.mrf.mxu1  ;;  %2834 = vmatpush3.msra.mxu0 %v1282_v54 }
 0x1dc   : > { %2835 = vmatprep.subr.mxu0 %v3075_v4  ;;  %v1254_v60 = vadd.f32 %v1253_v62, %v3757_v55  ;;  %v1285_v63 = vmax.f32 %v1259_v28, 0.0  ;;  %v2948_v55 = vld [vmem:[%s3218_s13 + $0xc] sm:$0x1] }
 0x1dd   : > { %v2808_v8 = vpop.f32.mrf.mxu1  ;;  %2836 = vmatpush3.msra.mxu0 %v1281_v25 }
 0x1de   : > { %v1269_v59 = vadd.f32 %v2808_v8, %v3754_v48  ;;  %2837 = vmatprep.subr.mxu0 %v3075_v4  ;;  %v1284_v14 = vmax.f32 %v1254_v60, 0.0 }
 0x1df   : > { %v1263_v35 = vpop.f32.mrf.mxu1  ;;  %2838 = vmatpush3.msra.mxu0 %v1280_v7 }
 0x1e0   : > { %v1287_v27 = vmax.f32 %v1269_v59, 0.0  ;;  %v1264_v61 = vadd.f32 %v1263_v35, %v3750_v32  ;;  %2840 = vmatmul.mubr.msk.f32.vlgmr.msra.gmra.mxu0 %vm1295_vm10, %v3767_v6 }
 0x1e2   : > { %v1286_v38 = vmax.f32 %v1264_v61, 0.0  ;;  %2843 = vmatpush3.msra.mxu1 %v1287_v27 }
 0x1e3   : > { %2844 = vmatprep.subr.mxu1 %v3075_v4 }
 0x1e4   : > { %2845 = vmatpush3.msra.mxu1 %v1286_v38 }
 0x1e5   : > { %2846 = vmatprep.subr.mxu1 %v3075_v4 }
 0x1e6   : > { %2847 = vmatpush3.msra.mxu1 %v1285_v63 }
 0x1e7   : > { %2848 = vmatprep.subr.mxu1 %v3075_v4 }
 0x1e8   : > { %2849 = vmatpush3.msra.mxu1 %v1284_v14 }
 0x1e9   : > { %2851 = vmatmul.mubr.msk.f32.vlgmr.msra.gmra.mxu1 %vm1295_vm10, %v3767_v6 }
 0x288   : > { %v1365_v15 = vpop.f32.mrf.mxu0 }
 0x289   : > { %v1366_v39 = vadd.f32 %v1365_v15, %v3805_v43 }
 0x28a   : > { %v2819_v50 = vpop.f32.mrf.mxu0 }
 0x28b   : > { %v1583_v56 = vrot.slane %v1366_v39, 1  ;;  %v1584_v3 = vrot.slane %v1366_v39, 2  ;;  %v1585_v58 = vrot.slane %v1366_v39, 3  ;;  %v1586_v24 = vrot.slane %v1366_v39, 4 }
 0x28c   : > { %v1587_v4 = vrot.slane %v1366_v39, 5  ;;  %v1588_v46 = vrot.slane %v1366_v39, 6  ;;  %v1589_v32 = vrot.slane %v1366_v39, 7  ;;  %v3809_v13 = vadd.f32 %v2945_v11, %v1366_v39 }
 0x28d   : > { %v3812_v48 = vadd.f32 %v2946_v16, %v1583_v56  ;;  %v3815_v21 = vadd.f32 %v2947_v19, %v1584_v3  ;;  %v3818_v30 = vadd.f32 %v2948_v55, %v1585_v58  ;;  %v3821_v9 = vadd.f32 %v2949_v5, %v1586_v24  ;;  %v2953_v58 = vld [vmem:[%s3218_s13 + $0x1] sm:$0x1]  ;;  %v2956_v16 = vld [vmem:[%s3218_s13 + $0xd] sm:$0x1]  ;;  %v2957_v55 = vld [vmem:[%s3218_s13 + $0x11] sm:$0x1] }
 0x28e   : > { %4498 = vst [vmem:[#allocation8_spill] sm:$0xff] %v3809_v13  ;;  %v3824_v1 = vadd.f32 %v2950_v10, %v1587_v4  ;;  %v3827_v52 = vadd.f32 %v2951_v36, %v1588_v46  ;;  %v3830_v41 = vadd.f32 %v2952_v57, %v1589_v32  ;;  %v1783_v12 = vmul.f32 %v3809_v13, %v3809_v13  ;;  %v2954_v4 = vld [vmem:[%s3218_s13 + $0x5] sm:$0x1]  ;;  %v2955_v32 = vld [vmem:[%s3218_s13 + $0x9] sm:$0x1] }
 0x28f   : > { %4499 = vst [vmem:[#allocation9_spill] sm:$0xff] %v3812_v48  ;;  %4500 = vst [vmem:[#allocation10_spill] sm:$0xff] %v3815_v21  ;;  %v1707_v6 = vrot.slane %v3812_v48, 7  ;;  %v1709_v44 = vrot.slane %v3815_v21, 6  ;;  %v1711_v45 = vrot.slane %v3818_v30, 5  ;;  %v1713_v31 = vrot.slane %v3821_v9, 4 }
 0x290   : > { %4501 = vst [vmem:[#allocation11_spill] sm:$0xff] %v3818_v30  ;;  %4502 = vst [vmem:[#allocation12_spill] sm:$0xff] %v3821_v9  ;;  %v1715_v51 = vrot.slane %v3824_v1, 3  ;;  %v1784_v23 = vmul.f32 %v3812_v48, %v3812_v48  ;;  %v1785_v17 = vmul.f32 %v3815_v21, %v3815_v21  ;;  %v1786_v29 = vmul.f32 %v3818_v30, %v3818_v30  ;;  %v2958_v10 = vld [vmem:[%s3218_s13 + $0x15] sm:$0x1] }
 0x291   : > { %4503 = vst [vmem:[#allocation13_spill] sm:$0xff] %v3824_v1  ;;  %4504 = vst [vmem:[#allocation14_spill] sm:$0xff] %v3827_v52  ;;  %v1708_v53 = vsel %vm336_vm0, %v1707_v6, %v3809_v13  ;;  %v1787_v34 = vmul.f32 %v3821_v9, %v3821_v9  ;;  %v1717_v33 = vrot.slane %v3827_v52, 2  ;;  %v1788_v40 = vmul.f32 %v3824_v1, %v3824_v1  ;;  %v2959_v57 = vld [vmem:[%s3218_s13 + $0x19] sm:$0x1] }
 0x292   : > { %4505 = vst [vmem:[#allocation15_spill] sm:$0xff] %v3830_v41  ;;  %v1710_v0 = vsel %vm339_vm1, %v1709_v44, %v1708_v53  ;;  %v1789_v2 = vmul.f32 %v3827_v52, %v3827_v52  ;;  %v1847_v37 = vrot.slane %v1784_v23, 7  ;;  %v1849_v42 = vrot.slane %v1785_v17, 6  ;;  %v2960_v44 = vld [vmem:[%s3218_s13 + $0x1d] sm:$0x1] }
 0x293   : > { %v1712_v26 = vsel %vm342_vm2, %v1711_v45, %v1710_v0  ;;  %v1719_v47 = vrot.slane %v3830_v41, 1  ;;  %v1790_v20 = vmul.f32 %v3830_v41, %v3830_v41  ;;  %v1851_v54 = vrot.slane %v1786_v29, 5 }
 0x294   : > { %v1435_v49 = vpop.f32.mrf.mxu1  ;;  %v1714_v18 = vsel %vm345_vm3, %v1713_v31, %v1712_v26  ;;  %v1848_v7 = vsel %vm336_vm0, %v1847_v37, %v1783_v12  ;;  %v1853_v8 = vrot.slane %v1787_v34, 4  ;;  %v1855_v27 = vrot.slane %v1788_v40, 3 }
 0x295   : > { %v1436_v25 = vadd.f32 %v1435_v49, %v3805_v43  ;;  %v1716_v62 = vsel %vm348_vm4, %v1715_v51, %v1714_v18  ;;  %v1850_v28 = vsel %vm339_vm1, %v1849_v42, %v1848_v7  ;;  %v1857_v61 = vrot.slane %v1789_v2, 2 }
 0x296   : > { %v2830_v59 = vpop.f32.mrf.mxu1  ;;  %v1718_v35 = vsel %vm351_vm5, %v1717_v33, %v1716_v62  ;;  %v1852_v12 = vsel %vm342_vm2, %v1851_v54, %v1850_v28  ;;  %v1859_v29 = vrot.slane %v1790_v20, 1 }
 0x297   : > { %v1720_v60 = vsel %vm354_vm6, %v1719_v47, %v1718_v35  ;;  %v1590_v38 = vrot.slane %v1436_v25, 1  ;;  %v1591_v63 = vrot.slane %v1436_v25, 2  ;;  %v1592_v14 = vrot.slane %v1436_v25, 3 }
 0x298   : > { %v1767_v15 = vsel %vm402_vm7, %v1720_v60, 0.0  ;;  %v1593_v39 = vrot.slane %v1436_v25, 4  ;;  %v1594_v50 = vrot.slane %v1436_v25, 5  ;;  %v1595_v56 = vrot.slane %v1436_v25, 6 }
 0x299   : > { %1768 = vadd.xlane.f32.xlu1 %v1767_v15  ;;  %v1596_v3 = vrot.slane %v1436_v25, 7  ;;  %v3868_v24 = vadd.f32 %v2953_v58, %v1436_v25  ;;  %v3871_v46 = vadd.f32 %v2954_v4, %v1590_v38  ;;  %v3874_v11 = vadd.f32 %v2955_v32, %v1591_v63 }
 0x29a   : > { %v3877_v19 = vadd.f32 %v2956_v16, %v1592_v14  ;;  %v3880_v5 = vadd.f32 %v2957_v55, %v1593_v39  ;;  %v3883_v36 = vadd.f32 %v2958_v10, %v1594_v50  ;;  %v3886_v6 = vadd.f32 %v2959_v57, %v1595_v56  ;;  %v2961_v55 = vld [vmem:[%s3218_s13 + $0x2] sm:$0x1]  ;;  %v2962_v57 = vld [vmem:[%s3218_s13 + $0x6] sm:$0x1] }
 0x29b   : > { %v3889_v45 = vadd.f32 %v2960_v44, %v1596_v3  ;;  %v1721_v31 = vrot.slane %v3871_v46, 7  ;;  %v1723_v51 = vrot.slane %v3874_v11, 6  ;;  %v1854_v40 = vsel %vm345_vm3, %v1853_v8, %v1852_v12  ;;  %v2964_v12 = vld [vmem:[%s3218_s13 + $0xe] sm:$0x1] }
 0x29c   : > { %4506 = vst [vmem:[#allocation16_spill] sm:$0xff] %v3883_v36  ;;  %4507 = vst [vmem:[#allocation17_spill] sm:$0xff] %v3886_v6  ;;  %v1725_v23 = vrot.slane %v3877_v19, 5  ;;  %v1727_v53 = vrot.slane %v3880_v5, 4  ;;  %v1729_v17 = vrot.slane %v3883_v36, 3  ;;  %v1731_v0 = vrot.slane %v3886_v6, 2 }
 0x29d   : > { %4508 = vst [vmem:[#allocation18_spill] sm:$0xff] %v3889_v45  ;;  %v1722_v34 = vsel %vm336_vm0, %v1721_v31, %v3868_v24  ;;  %v1733_v33 = vrot.slane %v3889_v45, 1  ;;  %v1856_v26 = vsel %vm348_vm4, %v1855_v27, %v1854_v40  ;;  %v1792_v37 = vmul.f32 %v3871_v46, %v3871_v46  ;;  %v2963_v31 = vld [vmem:[%s3218_s13 + $0xa] sm:$0x1]  ;;  %v2968_v40 = vld [vmem:[%s3218_s13 + $0x1e] sm:$0x1] }
 0x29e   : > { %v1724_v2 = vsel %vm339_vm1, %v1723_v51, %v1722_v34  ;;  %v1793_v42 = vmul.f32 %v3874_v11, %v3874_v11  ;;  %v1858_v18 = vsel %vm351_vm5, %v1857_v61, %v1856_v26  ;;  %v1791_v47 = vmul.f32 %v3868_v24, %v3868_v24 }
 0x29f   : > { %v1726_v49 = vsel %vm342_vm2, %v1725_v23, %v1724_v2  ;;  %v1794_v20 = vmul.f32 %v3877_v19, %v3877_v19  ;;  %v1860_v62 = vsel %vm354_vm6, %v1859_v29, %v1858_v18  ;;  %v1795_v7 = vmul.f32 %v3880_v5, %v3880_v5  ;;  %v2966_v29 = vld [vmem:[%s3218_s13 + $0x16] sm:$0x1] }
 0x2a0   : > { %v1505_v54 = vpop.f32.mrf.mxu0  ;;  %v1728_v25 = vsel %vm345_vm3, %v1727_v53, %v1726_v49  ;;  %v1796_v8 = vmul.f32 %v3883_v36, %v3883_v36  ;;  %v1907_v28 = vsel %vm402_vm7, %v1860_v62, 0.0  ;;  %v1797_v27 = vmul.f32 %v3886_v6, %v3886_v6  ;;  %v2965_v53 = vld [vmem:[%s3218_s13 + $0x12] sm:$0x1] }
 0x2a1   : > { %v1506_v59 = vadd.f32 %v1505_v54, %v3805_v43  ;;  %v1730_v35 = vsel %vm348_vm4, %v1729_v17, %v1728_v25  ;;  %v1798_v38 = vmul.f32 %v3889_v45, %v3889_v45  ;;  %v1861_v63 = vrot.slane %v1792_v37, 7 }
 0x2a2   : > { %v2841_v61 = vpop.f32.mrf.mxu0  ;;  %v1732_v60 = vsel %vm351_vm5, %v1731_v0, %v1730_v35  ;;  %v1863_v14 = vrot.slane %v1793_v42, 6  ;;  %v2967_v0 = vld [vmem:[%s3218_s13 + $0x1a] sm:$0x1]  ;;  %v1865_v25 = vrot.slane %v1794_v20, 5 }
 0x2a3   : > { %v1734_v15 = vsel %vm354_vm6, %v1733_v33, %v1732_v60  ;;  %v1597_v39 = vrot.slane %v1506_v59, 1  ;;  %v1598_v50 = vrot.slane %v1506_v59, 2  ;;  %v1599_v56 = vrot.slane %v1506_v59, 3 }
 0x2a4   : > { %v1770_v3 = vsel %vm402_vm7, %v1734_v15, 0.0  ;;  %v1600_v58 = vrot.slane %v1506_v59, 4  ;;  %v1601_v4 = vrot.slane %v1506_v59, 5  ;;  %v1602_v32 = vrot.slane %v1506_v59, 6 }
 0x2a5   : > { %1771 = vadd.xlane.f32.xlu0 %v1770_v3  ;;  %v1603_v16 = vrot.slane %v1506_v59, 7  ;;  %v3931_v10 = vadd.f32 %v2961_v55, %v1506_v59  ;;  %v3934_v44 = vadd.f32 %v2962_v57, %v1597_v39  ;;  %v3937_v51 = vadd.f32 %v2963_v31, %v1598_v50 }
 0x2a6   : > { %v3940_v23 = vadd.f32 %v2964_v12, %v1599_v56  ;;  %v3943_v17 = vadd.f32 %v2965_v53, %v1600_v58  ;;  %v3946_v34 = vadd.f32 %v2966_v29, %v1601_v4  ;;  %v3949_v33 = vadd.f32 %v2967_v0, %v1602_v32 }
 0x2a7   : > { %4509 = vst [vmem:[#allocation19_spill] sm:$0xff] %v3934_v44  ;;  %4510 = vst [vmem:[#allocation20_spill] sm:$0xff] %v3937_v51  ;;  %v3952_v2 = vadd.f32 %v2968_v40, %v1603_v16  ;;  %v1735_v26 = vrot.slane %v3934_v44, 7  ;;  %v1737_v37 = vrot.slane %v3937_v51, 6  ;;  %v1862_v42 = vsel %vm336_vm0, %v1861_v63, %v1791_v47 }
 0x2a8   : > { %4511 = vst [vmem:[#allocation21_spill] sm:$0xff] %v3940_v23  ;;  %4512 = vst [vmem:[#allocation22_spill] sm:$0xff] %v3943_v17  ;;  %v1739_v49 = vrot.slane %v3940_v23, 5  ;;  %v1741_v18 = vrot.slane %v3943_v17, 4  ;;  %v1743_v54 = vrot.slane %v3946_v34, 3  ;;  %v1745_v35 = vrot.slane %v3949_v33, 2 }
 0x2a9   : > { %4513 = vst [vmem:[#allocation23_spill] sm:$0xff] %v3946_v34  ;;  %4514 = vst [vmem:[#allocation24_spill] sm:$0xff] %v3949_v33  ;;  %v1575_v62 = vpop.f32.mrf.mxu1  ;;  %1908 = vadd.xlane.f32.xlu0 %v1907_v28  ;;  %v1736_v59 = vsel %vm336_vm0, %v1735_v26, %v3931_v10  ;;  %v1864_v61 = vsel %vm339_vm1, %v1863_v14, %v1862_v42  ;;  %v1867_v60 = vrot.slane %v1795_v7, 4  ;;  %v1747_v47 = vrot.slane %v3952_v2, 1 }
 0x2aa   : > { %4515 = vst [vmem:[#allocation25_spill] sm:$0xff] %v3952_v2  ;;  %v1738_v15 = vsel %vm339_vm1, %v1737_v37, %v1736_v59  ;;  %v1866_v63 = vsel %vm342_vm2, %v1865_v25, %v1864_v61  ;;  %v1869_v39 = vrot.slane %v1796_v8, 3  ;;  %v3968_v50 = vadd.f32 %v1575_v62, %v3805_v43 }
 0x2ab   : > { %v2852_v20 = vpop.f32.mrf.mxu1  ;;  %v1740_v28 = vsel %vm342_vm2, %v1739_v49, %v1738_v15  ;;  %v1868_v56 = vsel %vm345_vm3, %v1867_v60, %v1866_v63  ;;  %v1871_v3 = vrot.slane %v1797_v27, 2  ;;  %v1873_v14 = vrot.slane %v1798_v38, 1 }
 0x2ac   : > { %v1742_v58 = vsel %vm345_vm3, %v1741_v18, %v1740_v28  ;;  %v1870_v7 = vsel %vm348_vm4, %v1869_v39, %v1868_v56  ;;  %v1800_v4 = vmul.f32 %v3934_v44, %v3934_v44  ;;  %v1801_v43 = vmul.f32 %v3937_v51, %v3937_v51  ;;  %v2969_v20 = vld [vmem:[%s3218_s13 + $0x7] sm:$0x1] }
 0x2ad   : > { %v1744_v32 = vsel %vm348_vm4, %v1743_v54, %v1742_v58  ;;  %v1872_v8 = vsel %vm351_vm5, %v1871_v3, %v1870_v7  ;;  %v1802_v16 = vmul.f32 %v3940_v23, %v3940_v23  ;;  %v1803_v38 = vmul.f32 %v3943_v17, %v3943_v17  ;;  %v2970_v3 = vld [vmem:[%s3218_s13 + $0xb] sm:$0x1]  ;;  %v2971_v7 = vld [vmem:[%s3218_s13 + $0xf] sm:$0x1] }
 0x2ae   : > { %v1746_v27 = vsel %vm351_vm5, %v1745_v35, %v1744_v32  ;;  %v1874_v55 = vsel %vm354_vm6, %v1873_v14, %v1872_v8  ;;  %v1804_v57 = vmul.f32 %v3946_v34, %v3946_v34  ;;  %v1799_v53 = vmul.f32 %v3931_v10, %v3931_v10 }
 0x2af   : > { %v1748_v31 = vsel %vm354_vm6, %v1747_v47, %v1746_v27  ;;  %v1910_v12 = vsel %vm402_vm7, %v1874_v55, 0.0  ;;  %v1805_v0 = vmul.f32 %v3949_v33, %v3949_v33  ;;  %v1875_v40 = vrot.slane %v1800_v4, 7  ;;  %v2972_v4 = vld [vmem:[%s3218_s13 + $0x13] sm:$0x1]  ;;  %v2974_v55 = vld [vmem:[%s3218_s13 + $0x17] sm:$0x1] }
 0x2b0   : > { %v1773_v29 = vsel %vm402_vm7, %v1748_v31, 0.0  ;;  %1911 = vadd.xlane.f32.xlu0 %v1910_v12  ;;  %v1877_v26 = vrot.slane %v1801_v43, 6  ;;  %v1806_v37 = vmul.f32 %v3952_v2, %v3952_v2  ;;  %v1879_v42 = vrot.slane %v1802_v16, 5  ;;  %v2973_v16 = vld [vmem:[%s3218_s13 + $0x3] sm:$0x1] }
 0x2b1   : > { %1774 = vadd.xlane.f32.xlu1 %v1773_v29  ;;  %v1881_v49 = vrot.slane %v1803_v38, 4  ;;  %v1883_v18 = vrot.slane %v1804_v57, 3  ;;  %v1876_v54 = vsel %vm336_vm0, %v1875_v40, %v1799_v53  ;;  %v1604_v25 = vrot.slane %v3968_v50, 1  ;;  %v2975_v31 = vld [vmem:[%s3218_s13 + $0x1b] sm:$0x1] }
 0x2b2   : > { %v1605_v62 = vrot.slane %v3968_v50, 2  ;;  %v1606_v59 = vrot.slane %v3968_v50, 3  ;;  %v1878_v35 = vsel %vm339_vm1, %v1877_v26, %v1876_v54  ;;  %v1607_v61 = vrot.slane %v3968_v50, 4  ;;  %v2976_v40 = vld [vmem:[%s3218_s13 + $0x1f] sm:$0x1] }
 0x2b3   : > { %v1608_v60 = vrot.slane %v3968_v50, 5  ;;  %v1609_v15 = vrot.slane %v3968_v50, 6  ;;  %v1880_v47 = vsel %vm342_vm2, %v1879_v42, %v1878_v35  ;;  %v1885_v63 = vrot.slane %v1805_v0, 2 }
 0x2b4   : > { %v1610_v39 = vrot.slane %v3968_v50, 7  ;;  %v4008_v28 = vadd.f32 %v2969_v20, %v1604_v25  ;;  %v1882_v56 = vsel %vm345_vm3, %v1881_v49, %v1880_v47  ;;  %v4012_v58 = vadd.f32 %v2970_v3, %v1605_v62 }
 0x2b5   : > { %v4015_v14 = vadd.f32 %v2971_v7, %v1606_v59  ;;  %v4018_v32 = vadd.f32 %v2972_v4, %v1607_v61  ;;  %v1884_v8 = vsel %vm348_vm4, %v1883_v18, %v1882_v56  ;;  %v1887_v43 = vrot.slane %v1806_v37, 1 }
 0x2b6   : > { %v4023_v27 = vadd.f32 %v2973_v16, %v3968_v50  ;;  %v4026_v38 = vadd.f32 %v2974_v55, %v1608_v60  ;;  %v1886_v57 = vsel %vm351_vm5, %v1885_v63, %v1884_v8  ;;  %v4030_v12 = vadd.f32 %v2975_v31, %v1609_v15 }
 0x2b7   : > { %v1749_v53 = vrot.slane %v4008_v28, 7  ;;  %v1751_v29 = vrot.slane %v4012_v58, 6  ;;  %v1888_v0 = vsel %vm354_vm6, %v1887_v43, %v1886_v57  ;;  %v4036_v26 = vadd.f32 %v2976_v40, %v1610_v39 }
 0x2b8   : > { %v1753_v50 = vrot.slane %v4015_v14, 5  ;;  %v1913_v37 = vsel %vm402_vm7, %v1888_v0, 0.0  ;;  %v1755_v49 = vrot.slane %v4018_v32, 4  ;;  %v1757_v18 = vrot.slane %v4026_v38, 3 }
 0x2b9   : > { %v1750_v42 = vsel %vm336_vm0, %v1749_v53, %v4023_v27  ;;  %1914 = vadd.xlane.f32.xlu1 %v1913_v37  ;;  %v1808_v25 = vmul.f32 %v4008_v28, %v4008_v28  ;;  %v1809_v62 = vmul.f32 %v4012_v58, %v4012_v58  ;;  %v1810_v59 = vmul.f32 %v4015_v14, %v4015_v14 }
 0x2ba   : > { %v1752_v54 = vsel %vm339_vm1, %v1751_v29, %v1750_v42  ;;  %v1759_v61 = vrot.slane %v4030_v12, 2  ;;  %v1807_v60 = vmul.f32 %v4023_v27, %v4023_v27  ;;  %v1811_v15 = vmul.f32 %v4018_v32, %v4018_v32 }
 0x2bb   : > { %v1754_v35 = vsel %vm342_vm2, %v1753_v50, %v1752_v54  ;;  %v1812_v63 = vmul.f32 %v4026_v38, %v4026_v38  ;;  %v1889_v39 = vrot.slane %v1808_v25, 7  ;;  %v1891_v20 = vrot.slane %v1809_v62, 6  ;;  %v2168_v25 = vld [vmem:[%s4464_s4 + $0x8] sm:$0xff]  ;;  %v2167_v62 = vld [vmem:[%s4464_s4] sm:$0xff] }
 0x2bc   : > { %v1756_v47 = vsel %vm345_vm3, %v1755_v49, %v1754_v35  ;;  %v1761_v3 = vrot.slane %v4036_v26, 1  ;;  %v1813_v7 = vmul.f32 %v4030_v12, %v4030_v12  ;;  %v1814_v8 = vmul.f32 %v4036_v26, %v4036_v26  ;;  %2853 = vmatprep.subr.mxu0 %v2168_v25 }
 0x2bd   : > { %v1758_v56 = vsel %vm348_vm4, %v1757_v18, %v1756_v47  ;;  %v1890_v43 = vsel %vm336_vm0, %v1889_v39, %v1807_v60  ;;  %v1893_v16 = vrot.slane %v1810_v59, 5  ;;  %v1895_v31 = vrot.slane %v1811_v15, 4  ;;  %2854 = vmatpush3.msra.mxu0 %v2168_v25 }
 0x2be   : > { %v1760_v4 = vsel %vm351_vm5, %v1759_v61, %v1758_v56  ;;  %v1892_v57 = vsel %vm339_vm1, %v1891_v20, %v1890_v43  ;;  %v1897_v0 = vrot.slane %v1812_v63, 3  ;;  %v1899_v50 = vrot.slane %v1813_v7, 2  ;;  %2855 = vmatprep.subr.mxu0 %v2167_v62 }
 0x2bf   : > { %v1762_v55 = vsel %vm354_vm6, %v1761_v3, %v1760_v4  ;;  %v1894_v29 = vsel %vm342_vm2, %v1893_v16, %v1892_v57  ;;  %v1901_v42 = vrot.slane %v1814_v8, 1  ;;  %2856 = vmatpush3.msra.mxu0 %v2167_v62  ;;  %v2133_v56 = vsub.s32 3, %v3489_v22 }
 0x2c0   : > { %v1776_v53 = vsel %vm402_vm7, %v1762_v55, 0.0  ;;  %v1896_v40 = vsel %vm345_vm3, %v1895_v31, %v1894_v29 }
 0x2c1   : > { %1777 = vadd.xlane.f32.xlu0 %v1776_v53  ;;  %v1898_v37 = vsel %vm348_vm4, %v1897_v0, %v1896_v40  ;;  %v4104_v40 = vld [vmem:[%s4461_s1] sm:$0xff] }
 0x2c2   : > { %v1900_v49 = vsel %vm351_vm5, %v1899_v50, %v1898_v37  ;;  %v4107_v50 = vrot.slane %v4104_v40, %v2133_v56 }
 0x2c3   : > { %v1902_v18 = vsel %vm354_vm6, %v1901_v42, %v1900_v49 }
 0x2c4   : > { %v1916_v54 = vsel %vm402_vm7, %v1902_v18, 0.0 }
 0x2c5   : > { %1917 = vadd.xlane.f32.xlu0 %v1916_v54 }
 0x322   : > { %v1769_v59 = vpop.xlane.xlu1 %1768 }
 0x323   : > { %v4083_v61 = vmul.f32 0.0625, %v1769_v59 }
 0x325   : > { %v1923_v47 = vmul.f32 %v4083_v61, %v4083_v61  ;;  %v1935_v3 = vrot.slane %v4083_v61, 1  ;;  %v1936_v7 = vrot.slane %v4083_v61, 2  ;;  %v1937_v8 = vrot.slane %v4083_v61, 3 }
 0x326   : > { %v1938_v43 = vrot.slane %v4083_v61, 4  ;;  %v1939_v16 = vrot.slane %v4083_v61, 5  ;;  %v1940_v53 = vrot.slane %v4083_v61, 6  ;;  %v1941_v29 = vrot.slane %v4083_v61, 7 }
 0x327   : > { %v1995_v0 = vsub.f32 %v3809_v13, %v4083_v61  ;;  %v1996_v42 = vsub.f32 %v3812_v48, %v1935_v3  ;;  %v1997_v49 = vsub.f32 %v3815_v21, %v1936_v7  ;;  %v1998_v25 = vsub.f32 %v3818_v30, %v1937_v8 }
 0x328   : > { %v1999_v62 = vsub.f32 %v3821_v9, %v1938_v43  ;;  %v2000_v59 = vsub.f32 %v3824_v1, %v1939_v16  ;;  %v2001_v61 = vsub.f32 %v3827_v52, %v1940_v53 }
 0x32e   : > { %v1772_v35 = vpop.xlane.xlu0 %1771 }
 0x32f   : > { %v4087_v39 = vmul.f32 0.0625, %v1772_v35 }
 0x331   : > { %v1924_v57 = vmul.f32 %v4087_v39, %v4087_v39  ;;  %v1942_v18 = vrot.slane %v4087_v39, 1  ;;  %v1947_v56 = vrot.slane %v4087_v39, 6  ;;  %v1948_v3 = vrot.slane %v4087_v39, 7 }
 0x332   : > { %v1909_v60 = vpop.xlane.xlu0 %1908 }
 0x333   : > { %v1919_v15 = vmul.f32 0.0625, %v1909_v60  ;;  %v2002_v60 = vsub.f32 %v3830_v41, %v1941_v29  ;;  %v4150_v41 = vsub.f32 %v3886_v6, %v1947_v56  ;;  %v4155_v1 = vsub.f32 %v3889_v45, %v1948_v3 }
 0x335   : > { %v1927_v63 = vsub.f32 %v1919_v15, %v1923_v47  ;;  %v1943_v15 = vrot.slane %v4087_v39, 2  ;;  %v1944_v47 = vrot.slane %v4087_v39, 3 }
 0x337   : > { %v2027_v20 = vadd.f32 1.013279e-06, %v1927_v63  ;;  %v1945_v63 = vrot.slane %v4087_v39, 4 }
 0x339   : > { %2937 = vrsqrt.f32 %v2027_v20  ;;  %v1912_v4 = vpop.xlane.xlu0 %1911  ;;  %v1946_v20 = vrot.slane %v4087_v39, 5 }
 0x33a   : > { %v1775_v55 = vpop.xlane.xlu1 %1774  ;;  %v1920_v31 = vmul.f32 0.0625, %v1912_v4  ;;  %v4128_v4 = vsub.f32 %v3871_v46, %v1942_v18  ;;  %v4141_v18 = vsub.f32 %v3877_v19, %v1944_v47 }
 0x33b   : > { %v4112_v54 = vmul.f32 0.0625, %v1775_v55  ;;  %v4147_v7 = vsub.f32 %v3883_v36, %v1946_v20 }
 0x33c   : > { %v1928_v37 = vsub.f32 %v1920_v31, %v1924_v57  ;;  %v4135_v57 = vsub.f32 %v3874_v11, %v1943_v15 }
 0x33d   : > { %v1949_v8 = vrot.slane %v4112_v54, 1  ;;  %v1950_v43 = vrot.slane %v4112_v54, 2  ;;  %v1951_v16 = vrot.slane %v4112_v54, 3  ;;  %v1952_v55 = vrot.slane %v4112_v54, 4 }
 0x33e   : > { %v2028_v35 = vadd.f32 1.013279e-06, %v1928_v37  ;;  %v1953_v31 = vrot.slane %v4112_v54, 5  ;;  %v1954_v53 = vrot.slane %v4112_v54, 6  ;;  %v1955_v29 = vrot.slane %v4112_v54, 7 }
 0x33f   : > { %v1925_v15 = vmul.f32 %v4112_v54, %v4112_v54  ;;  %v4160_v9 = vsub.f32 %v3934_v44, %v1949_v8  ;;  %v4166_v20 = vsub.f32 %v3940_v23, %v1951_v16  ;;  %v4169_v56 = vsub.f32 %v3943_v17, %v1952_v55 }
 0x340   : > { %2939 = vrsqrt.f32 %v2028_v35  ;;  %v4144_v35 = vsub.f32 %v3880_v5, %v1945_v63  ;;  %v4163_v63 = vsub.f32 %v3937_v51, %v1950_v43  ;;  %v4172_v3 = vsub.f32 %v3946_v34, %v1953_v31 }
 0x341   : > { %v4175_v21 = vsub.f32 %v3949_v33, %v1954_v53  ;;  %v4178_v8 = vsub.f32 %v3952_v2, %v1955_v29 }
 0x342   : > { %v1915_v37 = vpop.xlane.xlu1 %1914 }
 0x343   : > { %v1921_v52 = vmul.f32 0.0625, %v1915_v37 }
 0x345   : > { %v1929_v37 = vsub.f32 %v1921_v52, %v1925_v15 }
 0x346   : > { %v2938_v30 = vpop.eup %2937 }
 0x347   : > { %v2039_v47 = vrot.slane %v2938_v30, 1  ;;  %v2040_v43 = vrot.slane %v2938_v30, 2  ;;  %v2041_v51 = vrot.slane %v2938_v30, 3  ;;  %v2042_v44 = vrot.slane %v2938_v30, 4 }
 0x348   : > { %v2029_v16 = vadd.f32 1.013279e-06, %v1929_v37  ;;  %v2043_v23 = vrot.slane %v2938_v30, 5  ;;  %v2044_v48 = vrot.slane %v2938_v30, 6  ;;  %v2045_v55 = vrot.slane %v2938_v30, 7 }
 0x349   : > { %v2099_v17 = vmul.f32 %v2938_v30, %v1995_v0  ;;  %v2100_v13 = vmul.f32 %v2039_v47, %v1996_v42  ;;  %v2101_v52 = vmul.f32 %v2040_v43, %v1997_v49  ;;  %v2102_v15 = vmul.f32 %v2041_v51, %v1998_v25 }
 0x34a   : > { %2941 = vrsqrt.f32 %v2029_v16  ;;  %v1778_v31 = vpop.xlane.xlu0 %1777  ;;  %v2103_v34 = vmul.f32 %v2042_v44, %v1999_v62  ;;  %v2104_v53 = vmul.f32 %v2043_v23, %v2000_v59  ;;  %v2105_v33 = vmul.f32 %v2044_v48, %v2001_v61 }
 0x34b   : > { %v4180_v45 = vmul.f32 0.0625, %v1778_v31  ;;  %v2106_v29 = vmul.f32 %v2045_v55, %v2002_v60  ;;  %v2135_v2 = vmul.f32 %v4107_v50, %v2099_v17  ;;  %v2136_v6 = vmul.f32 %v4107_v50, %v2100_v13 }
 0x34c   : > { %v2137_v37 = vmul.f32 %v4107_v50, %v2101_v52  ;;  %v2138_v36 = vmul.f32 %v4107_v50, %v2102_v15  ;;  %v2139_v30 = vmul.f32 %v4107_v50, %v2103_v34  ;;  %v2140_v51 = vmul.f32 %v4107_v50, %v2104_v53 }
 0x34d   : > { %v2940_v0 = vpop.eup %2939  ;;  %v1926_v44 = vmul.f32 %v4180_v45, %v4180_v45  ;;  %v2141_v48 = vmul.f32 %v4107_v50, %v2105_v33  ;;  %v2142_v23 = vmul.f32 %v4107_v50, %v2106_v29  ;;  %v2205_v42 = vrot.slane %v2136_v6, 7 }
 0x34e   : > { %v2207_v17 = vrot.slane %v2137_v37, 6  ;;  %v2209_v49 = vrot.slane %v2138_v36, 5  ;;  %v2211_v13 = vrot.slane %v2139_v30, 4  ;;  %v2213_v25 = vrot.slane %v2140_v51, 3  ;;  %v1918_v62 = vpop.xlane.xlu0 %1917 }
 0x34f   : > { %v2206_v59 = vsel %vm336_vm0, %v2205_v42, %v2135_v2  ;;  %v2215_v61 = vrot.slane %v2141_v48, 2  ;;  %v2217_v34 = vrot.slane %v2142_v23, 1  ;;  %v2046_v60 = vrot.slane %v2940_v0, 1 }
 0x350   : > { %v1922_v47 = vmul.f32 0.0625, %v1918_v62  ;;  %v2208_v43 = vsel %vm339_vm1, %v2207_v17, %v2206_v59  ;;  %v2047_v16 = vrot.slane %v2940_v0, 2  ;;  %v2048_v55 = vrot.slane %v2940_v0, 3 }
 0x351   : > { %v2210_v33 = vsel %vm342_vm2, %v2209_v49, %v2208_v43  ;;  %v2049_v52 = vrot.slane %v2940_v0, 4  ;;  %v2050_v15 = vrot.slane %v2940_v0, 5  ;;  %v2051_v6 = vrot.slane %v2940_v0, 6 }
 0x352   : > { %v1930_v31 = vsub.f32 %v1922_v47, %v1926_v44  ;;  %v2212_v36 = vsel %vm345_vm3, %v2211_v13, %v2210_v33  ;;  %v2052_v53 = vrot.slane %v2940_v0, 7  ;;  %v4516_v2 = vsub.f32 %v3868_v24, %v4087_v39 }
 0x353   : > { %v2214_v37 = vsel %vm348_vm4, %v2213_v25, %v2212_v36  ;;  %v2108_v30 = vmul.f32 %v2046_v60, %v4128_v4  ;;  %v2109_v51 = vmul.f32 %v2047_v16, %v4135_v57  ;;  %v2110_v48 = vmul.f32 %v2048_v55, %v4141_v18 }
 0x354   : > { %v2107_v29 = vmul.f32 %v2940_v0, %v4516_v2  ;;  %v2030_v23 = vadd.f32 1.013279e-06, %v1930_v31  ;;  %v2216_v42 = vsel %vm351_vm5, %v2215_v61, %v2214_v37  ;;  %v2111_v44 = vmul.f32 %v2049_v52, %v4144_v35 }
 0x355   : > { %v2112_v17 = vmul.f32 %v2050_v15, %v4147_v7  ;;  %v2218_v49 = vsel %vm354_vm6, %v2217_v34, %v2216_v42  ;;  %v2113_v39 = vmul.f32 %v2051_v6, %v4150_v41  ;;  %v2114_v0 = vmul.f32 %v2052_v53, %v4155_v1 }
 0x356   : > { %v2143_v13 = vmul.f32 %v4107_v50, %v2107_v29  ;;  %2943 = vrsqrt.f32 %v2030_v23  ;;  %2857 = vmatprep.mubr.msk.f32.mxu0 %vm402_vm7, %v2218_v49  ;;  %v2144_v4 = vmul.f32 %v4107_v50, %v2108_v30  ;;  %v2145_v57 = vmul.f32 %v4107_v50, %v2109_v51 }
 0x357   : > { %v2146_v18 = vmul.f32 %v4107_v50, %v2110_v48  ;;  %v2942_v35 = vpop.eup %2941  ;;  %v2147_v7 = vmul.f32 %v4107_v50, %v2111_v44  ;;  %v2148_v25 = vmul.f32 %v4107_v50, %v2112_v17  ;;  %v2149_v41 = vmul.f32 %v4107_v50, %v2113_v39 }
 0x358   : > { %v2150_v1 = vmul.f32 %v4107_v50, %v2114_v0  ;;  %v2219_v62 = vrot.slane %v2144_v4, 7  ;;  %v2221_v59 = vrot.slane %v2145_v57, 6  ;;  %v2053_v34 = vrot.slane %v2942_v35, 1 }
 0x359   : > { %v2223_v61 = vrot.slane %v2146_v18, 5  ;;  %v2225_v60 = vrot.slane %v2147_v7, 4  ;;  %v2227_v47 = vrot.slane %v2148_v25, 3  ;;  %v2229_v43 = vrot.slane %v2149_v41, 2 }
 0x35a   : > { %v2231_v16 = vrot.slane %v2150_v1, 1  ;;  %v2220_v55 = vsel %vm336_vm0, %v2219_v62, %v2143_v13  ;;  %v2054_v33 = vrot.slane %v2942_v35, 2  ;;  %v2055_v52 = vrot.slane %v2942_v35, 3 }
 0x35b   : > { %v2056_v15 = vrot.slane %v2942_v35, 4  ;;  %v2222_v6 = vsel %vm339_vm1, %v2221_v59, %v2220_v55  ;;  %v2057_v31 = vrot.slane %v2942_v35, 5  ;;  %v2058_v36 = vrot.slane %v2942_v35, 6 }
 0x35c   : > { %v2059_v53 = vrot.slane %v2942_v35, 7  ;;  %v2224_v2 = vsel %vm342_vm2, %v2223_v61, %v2222_v6  ;;  %v4517_v29 = vsub.f32 %v3931_v10, %v4112_v54  ;;  %v2116_v30 = vmul.f32 %v2053_v34, %v4160_v9 }
 0x35d   : > { %v2117_v51 = vmul.f32 %v2054_v33, %v4163_v63  ;;  %v2226_v48 = vsel %vm345_vm3, %v2225_v60, %v2224_v2  ;;  %v2118_v23 = vmul.f32 %v2055_v52, %v4166_v20  ;;  %v2119_v42 = vmul.f32 %v2056_v15, %v4169_v56 }
 0x35e   : > { %v2115_v37 = vmul.f32 %v2942_v35, %v4517_v29  ;;  %v2120_v44 = vmul.f32 %v2057_v31, %v4172_v3  ;;  %v2228_v17 = vsel %vm348_vm4, %v2227_v47, %v2226_v48  ;;  %v2121_v49 = vmul.f32 %v2058_v36, %v4175_v21 }
 0x35f   : > { %v2122_v39 = vmul.f32 %v2059_v53, %v4178_v8  ;;  %v2230_v9 = vsel %vm351_vm5, %v2229_v43, %v2228_v17  ;;  %v2152_v63 = vmul.f32 %v4107_v50, %v2116_v30  ;;  %v2153_v0 = vmul.f32 %v4107_v50, %v2117_v51 }
 0x360   : > { %v2151_v54 = vmul.f32 %v4107_v50, %v2115_v37  ;;  %v2154_v20 = vmul.f32 %v4107_v50, %v2118_v23  ;;  %v2232_v56 = vsel %vm354_vm6, %v2231_v16, %v2230_v9  ;;  %v2155_v3 = vmul.f32 %v4107_v50, %v2119_v42 }
 0x361   : > { %v2156_v13 = vmul.f32 %v4107_v50, %v2120_v44  ;;  %v2157_v21 = vmul.f32 %v4107_v50, %v2121_v49  ;;  %2858 = vmatmul.mubr.msk.f32.vlgmr.msra.gmra.mxu0 %vm402_vm7, %v2232_v56  ;;  %v2158_v8 = vmul.f32 %v4107_v50, %v2122_v39  ;;  %v2233_v4 = vrot.slane %v2152_v63, 7 }
 0x362   : > { %v2235_v57 = vrot.slane %v2153_v0, 6  ;;  %v2237_v18 = vrot.slane %v2154_v20, 5  ;;  %v2239_v35 = vrot.slane %v2155_v3, 4  ;;  %v1956_v41 = vrot.slane %v4180_v45, 1 }
 0x363   : > { %v2241_v7 = vrot.slane %v2156_v13, 3  ;;  %v2243_v25 = vrot.slane %v2157_v21, 2  ;;  %v2944_v1 = vpop.eup %2943  ;;  %v2234_v62 = vsel %vm336_vm0, %v2233_v4, %v2151_v54  ;;  %v2245_v59 = vrot.slane %v2158_v8, 1 }
 0x364   : > { %v1957_v61 = vrot.slane %v4180_v45, 2  ;;  %v1958_v34 = vrot.slane %v4180_v45, 3  ;;  %v2236_v60 = vsel %vm339_vm1, %v2235_v57, %v2234_v62  ;;  %v1959_v47 = vrot.slane %v4180_v45, 4 }
 0x365   : > { %v1960_v43 = vrot.slane %v4180_v45, 5  ;;  %v1961_v16 = vrot.slane %v4180_v45, 6  ;;  %v2238_v55 = vsel %vm342_vm2, %v2237_v18, %v2236_v60  ;;  %v1962_v33 = vrot.slane %v4180_v45, 7 }
 0x366   : > { %v2019_v52 = vsub.f32 %v4023_v27, %v4180_v45  ;;  %v2020_v15 = vsub.f32 %v4008_v28, %v1956_v41  ;;  %v2240_v6 = vsel %vm345_vm3, %v2239_v35, %v2238_v55  ;;  %v2021_v31 = vsub.f32 %v4012_v58, %v1957_v61 }
 0x367   : > { %v2022_v36 = vsub.f32 %v4015_v14, %v1958_v34  ;;  %v2023_v53 = vsub.f32 %v4018_v32, %v1959_v47  ;;  %v2242_v2 = vsel %vm348_vm4, %v2241_v7, %v2240_v6  ;;  %v2024_v29 = vsub.f32 %v4026_v38, %v1960_v43  ;;  %v2360_v6 = vld [vmem:[%s4465_s5 + $0x10] sm:$0xff] }
 0x368   : > { %v2025_v37 = vsub.f32 %v4030_v12, %v1961_v16  ;;  %v2026_v30 = vsub.f32 %v4036_v26, %v1962_v33  ;;  %v2244_v45 = vsel %vm351_vm5, %v2243_v25, %v2242_v2  ;;  %v2060_v51 = vrot.slane %v2944_v1, 1 }
 0x369   : > { %v2061_v48 = vrot.slane %v2944_v1, 2  ;;  %v2062_v23 = vrot.slane %v2944_v1, 3  ;;  %v2246_v42 = vsel %vm354_vm6, %v2245_v59, %v2244_v45  ;;  %v2063_v44 = vrot.slane %v2944_v1, 4 }
 0x36a   : > { %v2064_v17 = vrot.slane %v2944_v1, 5  ;;  %v2065_v49 = vrot.slane %v2944_v1, 6  ;;  %2860 = vmatprep.mubr.msk.f32.mxu0 %vm402_vm7, %v2246_v42  ;;  %v2066_v39 = vrot.slane %v2944_v1, 7  ;;  %v2123_v54 = vmul.f32 %v2944_v1, %v2019_v52 }
 0x36b   : > { %v2124_v9 = vmul.f32 %v2060_v51, %v2020_v15  ;;  %v2125_v63 = vmul.f32 %v2061_v48, %v2021_v31  ;;  %v2126_v0 = vmul.f32 %v2062_v23, %v2022_v36  ;;  %v2127_v20 = vmul.f32 %v2063_v44, %v2023_v53  ;;  %v2359_v31 = vld [vmem:[%s4465_s5 + $0x8] sm:$0xff]  ;;  %v2358_v36 = vld [vmem:[%s4465_s5] sm:$0xff] }
 0x36c   : > { %v2128_v56 = vmul.f32 %v2064_v17, %v2024_v29  ;;  %v2129_v3 = vmul.f32 %v2065_v49, %v2025_v37  ;;  %v2130_v13 = vmul.f32 %v2066_v39, %v2026_v30  ;;  %v2159_v18 = vmul.f32 %v4107_v50, %v2123_v54 }
 0x36d   : > { %v2160_v21 = vmul.f32 %v4107_v50, %v2124_v9  ;;  %v2161_v8 = vmul.f32 %v4107_v50, %v2125_v63  ;;  %v2162_v4 = vmul.f32 %v4107_v50, %v2126_v0  ;;  %v2163_v57 = vmul.f32 %v4107_v50, %v2127_v20 }
 0x36e   : > { %v2164_v35 = vmul.f32 %v4107_v50, %v2128_v56  ;;  %v2165_v41 = vmul.f32 %v4107_v50, %v2129_v3  ;;  %v2166_v1 = vmul.f32 %v4107_v50, %v2130_v13  ;;  %v2361_v50 = vld [vmem:[%s4465_s5 + $0x18] sm:$0xff]  ;;  %v2171_v53 = vsub.s32 4, %v3489_v22 }
 0x36f   : > { %v2247_v7 = vrot.slane %v2160_v21, 7  ;;  %v2249_v25 = vrot.slane %v2161_v8, 6  ;;  %v2251_v59 = vrot.slane %v2162_v4, 5  ;;  %v2253_v34 = vrot.slane %v2163_v57, 4  ;;  %2863 = vmatprep.subr.mxu1 %v2361_v50 }
 0x370   : > { %v2255_v47 = vrot.slane %v2164_v35, 3  ;;  %v2257_v16 = vrot.slane %v2165_v41, 2  ;;  %v2259_v33 = vrot.slane %v2166_v1, 1  ;;  %2864 = vmatpush3.msra.mxu1 %v2361_v50  ;;  %v2172_v2 = vrot.slane %v4104_v40, %v2171_v53  ;;  %v4519_v1 = vld [vmem:[#allocation17_spill] sm:$0xff]  ;;  %v4524_v50 = vld [vmem:[#allocation11_spill] sm:$0xff] }
 0x371   : > { %v2248_v62 = vsel %vm336_vm0, %v2247_v7, %v2159_v18  ;;  %2865 = vmatprep.subr.mxu1 %v2360_v6  ;;  %v2364_v54 = vsub.s32 5, %v3489_v22  ;;  %v4526_v53 = vld [vmem:[#allocation13_spill] sm:$0xff] }
 0x372   : > { %v2250_v61 = vsel %vm339_vm1, %v2249_v25, %v2248_v62  ;;  %2866 = vmatpush3.msra.mxu1 %v2360_v6  ;;  %v4518_v25 = vld [vmem:[#allocation16_spill] sm:$0xff] }
 0x373   : > { %v2252_v60 = vsel %vm342_vm2, %v2251_v59, %v2250_v61  ;;  %2867 = vmatprep.subr.mxu1 %v2359_v31  ;;  %v4304_v9 = vrot.slane %v4104_v40, %v2364_v54  ;;  %v4520_v59 = vld [vmem:[#allocation18_spill] sm:$0xff] }
 0x374   : > { %v2254_v43 = vsel %vm345_vm3, %v2253_v34, %v2252_v60  ;;  %2868 = vmatpush3.msra.mxu1 %v2359_v31  ;;  %v4525_v31 = vld [vmem:[#allocation12_spill] sm:$0xff] }
 0x375   : > { %v2256_v55 = vsel %vm348_vm4, %v2255_v47, %v2254_v43  ;;  %2869 = vmatprep.subr.mxu1 %v2358_v36  ;;  %v4521_v43 = vld [vmem:[#allocation8_spill] sm:$0xff] }
 0x376   : > { %v2258_v52 = vsel %vm351_vm5, %v2257_v16, %v2256_v55  ;;  %2870 = vmatpush3.msra.mxu1 %v2358_v36  ;;  %v4522_v55 = vld [vmem:[#allocation9_spill] sm:$0xff] }
 0x377   : > { %v2260_v15 = vsel %vm354_vm6, %v2259_v33, %v2258_v52  ;;  %v4523_v52 = vld [vmem:[#allocation10_spill] sm:$0xff] }
 0x378   : > { %2861 = vmatmul.mubr.msk.f32.gmra.mxu0 %vm402_vm7, %v2260_v15 }
 0x421   : > { %v2859_v29 = vpop.f32.mrf.mxu0 }
 0x422   : > { %v2341_v37 = vadd.f32 %v2859_v29, %v2172_v2  ;;  %v4527_v29 = vld [vmem:[#allocation14_spill] sm:$0xff] }
 0x423   : > { %v2335_v30 = vpop.f32.mrf.mxu0 }
 0x424   : > { %v2336_v45 = vadd.f32 %v2335_v30, %v2172_v2  ;;  %v2355_v48 = vmax.f32 %v2341_v37, 0.0  ;;  %v4528_v30 = vld [vmem:[#allocation15_spill] sm:$0xff] }
 0x426   : > { %v2354_v51 = vmax.f32 %v2336_v45, 0.0 }
 0x428   : > { %2871 = vmatprep.mubr.msk.f32.mxu1 %vm1295_vm10, %v2354_v51 }
 0x429   : > { %2872 = vmatmul.mubr.msk.f32.vlgmr.msra.gmra.mxu1 %vm1295_vm10, %v2355_v48 }
 0x438   : > { %v2862_v23 = vpop.f32.mrf.mxu0 }
 0x439   : > { %v2351_v42 = vadd.f32 %v2862_v23, %v2172_v2 }
 0x43a   : > { %v2345_v44 = vpop.f32.mrf.mxu0 }
 0x43b   : > { %v2346_v17 = vadd.f32 %v2345_v44, %v2172_v2  ;;  %v2357_v39 = vmax.f32 %v2351_v42, 0.0 }
 0x43d   : > { %v2356_v49 = vmax.f32 %v2346_v17, 0.0 }
 0x43f   : > { %2874 = vmatprep.mubr.msk.f32.mxu1 %vm1295_vm10, %v2356_v49 }
 0x440   : > { %2875 = vmatmul.mubr.msk.f32.gmra.mxu1 %vm1295_vm10, %v2357_v39 }
 0x4e9   : > { %v2873_v63 = vpop.f32.mrf.mxu1 }
 0x4ea   : > { %v2450_v0 = vadd.f32 %v2873_v63, %v4304_v9 }
 0x4eb   : > { %v2444_v21 = vpop.f32.mrf.mxu1 }
 0x4ec   : > { %v2474_v20 = vrot.slane %v2450_v0, 1  ;;  %v2475_v56 = vrot.slane %v2450_v0, 2  ;;  %v2476_v3 = vrot.slane %v2450_v0, 3  ;;  %v2477_v13 = vrot.slane %v2450_v0, 4 }
 0x4ed   : > { %v2478_v8 = vrot.slane %v2450_v0, 5  ;;  %v2479_v4 = vrot.slane %v2450_v0, 6  ;;  %v2480_v57 = vrot.slane %v2450_v0, 7  ;;  %v2535_v18 = vadd.f32 %v2450_v0, %v3868_v24 }
 0x4ee   : > { %v2536_v22 = vadd.f32 %v2474_v20, %v3871_v46  ;;  %v2537_v40 = vadd.f32 %v2475_v56, %v3874_v11  ;;  %v2538_v35 = vadd.f32 %v2476_v3, %v3877_v19  ;;  %v2539_v7 = vadd.f32 %v2477_v13, %v3880_v5 }
 0x4ef   : > { %v2540_v41 = vadd.f32 %v2478_v8, %v4518_v25  ;;  %v2541_v62 = vadd.f32 %v2479_v4, %v4519_v1  ;;  %v2542_v61 = vadd.f32 %v2480_v57, %v4520_v59  ;;  %2568 = vst.msk [vmem:[%s4317_s8 + $0x1] sm:$0x1] %vm2559_vm11, %v2535_v18  ;;  %v2445_v24 = vadd.f32 %v2444_v21, %v4304_v9  ;;  %v4529_v57 = vld [vmem:[#allocation19_spill] sm:$0xff]  ;;  %v4532_v25 = vld [vmem:[#allocation22_spill] sm:$0xff] }
 0x4f0   : > { %2569 = vst.msk [vmem:[%s4317_s8 + $0x5] sm:$0x1] %vm2559_vm11, %v2536_v22  ;;  %2570 = vst.msk [vmem:[%s4317_s8 + $0x9] sm:$0x1] %vm2559_vm11, %v2537_v40  ;;  %v4530_v22 = vld [vmem:[#allocation20_spill] sm:$0xff] }
 0x4f1   : > { %2571 = vst.msk [vmem:[%s4317_s8 + $0xd] sm:$0x1] %vm2559_vm11, %v2538_v35  ;;  %2572 = vst.msk [vmem:[%s4317_s8 + $0x11] sm:$0x1] %vm2559_vm11, %v2539_v7  ;;  %v2467_v46 = vrot.slane %v2445_v24, 1  ;;  %v2468_v11 = vrot.slane %v2445_v24, 2  ;;  %v2527_v16 = vadd.f32 %v2445_v24, %v4521_v43 }
 0x4f2   : > { %2573 = vst.msk [vmem:[%s4317_s8 + $0x15] sm:$0x1] %vm2559_vm11, %v2540_v41  ;;  %2574 = vst.msk [vmem:[%s4317_s8 + $0x19] sm:$0x1] %vm2559_vm11, %v2541_v62  ;;  %v2469_v19 = vrot.slane %v2445_v24, 3  ;;  %v2470_v5 = vrot.slane %v2445_v24, 4 }
 0x4f3   : > { %2575 = vst.msk [vmem:[%s4317_s8 + $0x1d] sm:$0x1] %vm2559_vm11, %v2542_v61  ;;  %v2471_v34 = vrot.slane %v2445_v24, 5  ;;  %v2472_v60 = vrot.slane %v2445_v24, 6  ;;  %v2473_v47 = vrot.slane %v2445_v24, 7  ;;  %v2528_v33 = vadd.f32 %v2467_v46, %v4522_v55  ;;  %v4531_v35 = vld [vmem:[#allocation21_spill] sm:$0xff] }
 0x4f4   : > { %v2529_v15 = vadd.f32 %v2468_v11, %v4523_v52  ;;  %v2530_v6 = vadd.f32 %v2469_v19, %v4524_v50  ;;  %v2531_v36 = vadd.f32 %v2470_v5, %v4525_v31  ;;  %2560 = vst.msk [vmem:[%s4317_s8] sm:$0x1] %vm2559_vm11, %v2527_v16  ;;  %v4534_v62 = vld [vmem:[#allocation24_spill] sm:$0xff]  ;;  %v4535_v61 = vld [vmem:[#allocation25_spill] sm:$0xff] }
 0x4f5   : > { %v2532_v2 = vadd.f32 %v2471_v34, %v4526_v53  ;;  %v2533_v37 = vadd.f32 %v2472_v60, %v4527_v29  ;;  %v2534_v45 = vadd.f32 %v2473_v47, %v4528_v30  ;;  %2561 = vst.msk [vmem:[%s4317_s8 + $0x4] sm:$0x1] %vm2559_vm11, %v2528_v33 }
 0x4f6   : > { %2562 = vst.msk [vmem:[%s4317_s8 + $0x8] sm:$0x1] %vm2559_vm11, %v2529_v15  ;;  %2563 = vst.msk [vmem:[%s4317_s8 + $0xc] sm:$0x1] %vm2559_vm11, %v2530_v6 }
 0x4f7   : > { %2564 = vst.msk [vmem:[%s4317_s8 + $0x10] sm:$0x1] %vm2559_vm11, %v2531_v36  ;;  %2565 = vst.msk [vmem:[%s4317_s8 + $0x14] sm:$0x1] %vm2559_vm11, %v2532_v2 }
 0x4f8   : > { %2566 = vst.msk [vmem:[%s4317_s8 + $0x18] sm:$0x1] %vm2559_vm11, %v2533_v37  ;;  %2567 = vst.msk [vmem:[%s4317_s8 + $0x1c] sm:$0x1] %vm2559_vm11, %v2534_v45 }
 0x500   : > { %v2876_v51 = vpop.f32.mrf.mxu1 }
 0x501   : > { %v2460_v48 = vadd.f32 %v2876_v51, %v4304_v9 }
 0x502   : > { %v2454_v49 = vpop.f32.mrf.mxu1 }
 0x503   : > { %v2488_v23 = vrot.slane %v2460_v48, 1  ;;  %v2489_v42 = vrot.slane %v2460_v48, 2  ;;  %v2490_v44 = vrot.slane %v2460_v48, 3  ;;  %v2491_v17 = vrot.slane %v2460_v48, 4 }
 0x504   : > { %v2492_v39 = vrot.slane %v2460_v48, 5  ;;  %v2493_v54 = vrot.slane %v2460_v48, 6  ;;  %v2494_v63 = vrot.slane %v2460_v48, 7  ;;  %v2551_v0 = vadd.f32 %v2460_v48, %v4023_v27 }
 0x505   : > { %v2552_v20 = vadd.f32 %v2488_v23, %v4008_v28  ;;  %v2553_v56 = vadd.f32 %v2489_v42, %v4012_v58  ;;  %v2554_v3 = vadd.f32 %v2490_v44, %v4015_v14  ;;  %v2555_v13 = vadd.f32 %v2491_v17, %v4018_v32 }
 0x506   : > { %v2556_v21 = vadd.f32 %v2492_v39, %v4026_v38  ;;  %v2557_v8 = vadd.f32 %v2493_v54, %v4030_v12  ;;  %v2558_v4 = vadd.f32 %v2494_v63, %v4036_v26  ;;  %2584 = vst.msk [vmem:[%s4317_s8 + $0x3] sm:$0x1] %vm2559_vm11, %v2551_v0  ;;  %v2455_v27 = vadd.f32 %v2454_v49, %v4304_v9 }
 0x507   : > { %2585 = vst.msk [vmem:[%s4317_s8 + $0x7] sm:$0x1] %vm2559_vm11, %v2552_v20  ;;  %2586 = vst.msk [vmem:[%s4317_s8 + $0xb] sm:$0x1] %vm2559_vm11, %v2553_v56 }
 0x508   : > { %2587 = vst.msk [vmem:[%s4317_s8 + $0xf] sm:$0x1] %vm2559_vm11, %v2554_v3  ;;  %2588 = vst.msk [vmem:[%s4317_s8 + $0x13] sm:$0x1] %vm2559_vm11, %v2555_v13  ;;  %v2481_v28 = vrot.slane %v2455_v27, 1  ;;  %v2482_v58 = vrot.slane %v2455_v27, 2  ;;  %v2543_v9 = vadd.f32 %v2455_v27, %v3931_v10 }
 0x509   : > { %2589 = vst.msk [vmem:[%s4317_s8 + $0x17] sm:$0x1] %vm2559_vm11, %v2556_v21  ;;  %2590 = vst.msk [vmem:[%s4317_s8 + $0x1b] sm:$0x1] %vm2559_vm11, %v2557_v8  ;;  %v2483_v14 = vrot.slane %v2455_v27, 3  ;;  %v2484_v32 = vrot.slane %v2455_v27, 4 }
 0x50a   : > { %2591 = vst.msk [vmem:[%s4317_s8 + $0x1f] sm:$0x1] %vm2559_vm11, %v2558_v4  ;;  %v2485_v38 = vrot.slane %v2455_v27, 5  ;;  %v2486_v12 = vrot.slane %v2455_v27, 6  ;;  %v2487_v26 = vrot.slane %v2455_v27, 7  ;;  %v2544_v18 = vadd.f32 %v2481_v28, %v4529_v57  ;;  %v4533_v10 = vld [vmem:[#allocation23_spill] sm:$0xff] }
 0x50b   : > { %v2545_v40 = vadd.f32 %v2482_v58, %v4530_v22  ;;  %v2546_v7 = vadd.f32 %v2483_v14, %v4531_v35  ;;  %v2547_v41 = vadd.f32 %v2484_v32, %v4532_v25  ;;  %2576 = vst.msk [vmem:[%s4317_s8 + $0x2] sm:$0x1] %vm2559_vm11, %v2543_v9 }
 0x50c   : > { %v2548_v1 = vadd.f32 %v2485_v38, %v4533_v10  ;;  %v2549_v59 = vadd.f32 %v2486_v12, %v4534_v62  ;;  %v2550_v24 = vadd.f32 %v2487_v26, %v4535_v61  ;;  %2577 = vst.msk [vmem:[%s4317_s8 + $0x6] sm:$0x1] %vm2559_vm11, %v2544_v18 }
 0x50d   : > { %2578 = vst.msk [vmem:[%s4317_s8 + $0xa] sm:$0x1] %vm2559_vm11, %v2545_v40  ;;  %2579 = vst.msk [vmem:[%s4317_s8 + $0xe] sm:$0x1] %vm2559_vm11, %v2546_v7 }
 0x50e   : > { %2580 = vst.msk [vmem:[%s4317_s8 + $0x12] sm:$0x1] %vm2559_vm11, %v2547_v41  ;;  %2581 = vst.msk [vmem:[%s4317_s8 + $0x16] sm:$0x1] %vm2559_vm11, %v2548_v1 }
 0x50f   : > { %2582 = vst.msk [vmem:[%s4317_s8 + $0x1a] sm:$0x1] %vm2559_vm11, %v2549_v59  ;;  %2583 = vst.msk [vmem:[%s4317_s8 + $0x1e] sm:$0x1] %vm2559_vm11, %v2550_v24 }
 0x510   : > { %3019 = shalt.err (!%p3016_p10)
}
 0x511   : > { %s3020_s26 = scalar_lea.hbm %s4396_s19, 512  ;;  %s3024_s13 = scalar_lea.hbm %s4466_s6, 1024 }
 0x512   : > { %p3021_p0 = scmp.ne.s32.totalorder %s4396_s19, %s3020_s26  ;;  %p3025_p1 = scmp.lt.s32.totalorder %s4396_s19, %s4466_s6 }
 0x513   : > { %p3026_p3 = scmp.lt.s32.totalorder %s3024_s13, %s3020_s26 }
 0x514   : > { %p3022_p2 = pnand %p3021_p0, %p4536_p12 }
 0x515   : > { %p3027_p6 = por %p3026_p3, %p3025_p1 }
 0x516   : > { %p3023_p9 = pneg %p3022_p2 }
 0x518   : > { %p3028_p11 = pnand %p3027_p6, %p3023_p9 }
 0x51a   : > { %3031 = shalt.err (!%p3028_p11)
}
 0x51b   : > { %s3078_s25 = smov 64   ;;  %s3079_s18 = smov 4  }
 0x51c   : > { %2879 = dma.vmem_to_hbm [thread:$0]  (%p4536_p12), %s4398_s16, 512, %s4396_s19, %s2593_s20, %s3078_s25, %s3078_s25, %s3079_s18  }
 0x51d PF: > { %s2621_s11 = sand.u32 1, %s3058_s21   ;;  %p4537_p13 = scmp.ne.s32.totalorder %s4491_s10, 0 }
 0x51e   : > { %p4538_p4 = scmp.ge.s32.totalorder %s3070_s24, 2  ;;  %s2622_s14 = scalar_lea.sflag [#allocation4], %s2621_s11 }
 0x520   : > { %p2886_p5 = pnand %p4538_p4, %p4537_p13 }
 0x522   : > { %p2887_p7 = pneg %p2886_p5 }
 0x524   : > { %3053 = dma.done.wait (%p2887_p7), %s2622_s14, 512  }
 0x525   : > { %3055 = vsyncadd (%p2887_p7), %s2622_s14, 4294966784  ;;  %p19_p8 = scmp.ge.s32.totalorder %s3140_s27, 4   ;;  %s4539_s21 = smov %s3062_s22 }
 0x526   : > { %s4540_s22 = smov %s3066_s23  ;;  %s4541_s23 = smov %s3152_s30 }
 0x527   : > { %s4542_s24 = smov %s3140_s27  ;;  %21 = sbr.rel (!%p19_p8) target bundleno = 5 (0x5), region = 89 }
 0x52c   :  { %2627 = vsyncpa [#allocation3], 1 }
 0x52d   :  { %2629 = vsyncpa [#allocation3 + $0x1], 1 }
 0x52e   :  { %2630 = vsyncpa [#allocation4], 1 }
 0x52f   :  { %2632 = vsyncpa [#allocation4 + $0x1], 1 }

</bundles_post_ra>
